<compile_context>
chip_gen: v5e
topology: v5e:2x2
jax: 0.10.0
libtpu: 0.0.40
codegen_flags: <defaults>
</compile_context>

<pallas_src>
import functools

import jax
import jax.numpy as jnp
from jax.experimental import pallas as pl
from jax.experimental.pallas import tpu as pltpu

HID = 256
DIM = 1


def _round_up(n, m):
    return ((n + m - 1) // m) * m


def _leaky_relu(x, slope=0.01):
    # max-form: one vmax instead of compare + select.
    return jnp.maximum(x, slope * x)


def _stable_sigmoid(z):
    # sigmoid(z) = 1/(1+exp(-z)) for z>=0, exp(z)/(1+exp(z)) for z<0.
    pos = z >= 0
    ez = jnp.exp(jnp.where(pos, -z, z))        # exp of non-positive arg: no overflow
    return jnp.where(pos, 1.0, ez) / (1.0 + ez)


def _default_act_dtype():
    """bf16 elementwise on chips with a bf16 VPU (v6e/v7x), f32 otherwise."""
    try:
        kind = jax.devices()[0].device_kind.lower()
    except Exception:  # pragma: no cover
        return jnp.float32
    for tag in ("v2", "v3", "v4", "v5"):
        if tag in kind:
            return jnp.float32
    return jnp.bfloat16


def escape_mlp_kernel(x_ref,
                      w1_ref, b1_ref,
                      w2_ref, b2_ref,
                      w3_ref, b3_ref,
                      w4_ref, b4_ref,
                      o_ref, *, act_dtype):
    f32 = jnp.float32
    bf16 = jnp.bfloat16

    x = x_ref[...]                                        # [1, bt] f32 (lane-dense)

    # Layer 1: Linear(1 -> 256) + LeakyReLU.  K=1 -> VPU broadcast-multiply.
    h = _leaky_relu(w1_ref[...] * x + b1_ref[...])        # [256, bt] f32
    h = h.astype(bf16)                                    # MXU operand

    # Layer 2: Linear(256 -> 256) + LeakyReLU.  bf16 MXU operands, f32 acc.
    a = jnp.dot(w2_ref[...], h, preferred_element_type=f32)   # [256, bt] f32
    h = _leaky_relu(a.astype(act_dtype) + b2_ref[...])    # epilogue in act_dtype
    h = h.astype(bf16)

    # Layer 3: Linear(256 -> 256) + LeakyReLU.
    a = jnp.dot(w3_ref[...], h, preferred_element_type=f32)
    h = _leaky_relu(a.astype(act_dtype) + b3_ref[...])

    # Layer 4: Linear(256 -> 1) + Sigmoid.  N=1 -> VPU multiply + sublane reduce
    # (f32 products for accuracy; this layer is tiny relative to layers 2/3).
    z = jnp.sum(h.astype(f32) * w4_ref[...], axis=0, keepdims=True) + b4_ref[...]
    o_ref[...] = _stable_sigmoid(z)                       # [1, bt] f32


def escape_model_forward(x, params, *, batch_tile=2048, act_dtype=None):
    """x: [B, 1] float32 -> [B, 1] float32 (EscapeModel eval forward)."""
    if act_dtype is None:
        act_dtype = _default_act_dtype()

    B = x.shape[0]
    assert x.shape == (B, DIM)
    W1, b1, W2, b2, W3, b3, W4, b4 = params   # PyTorch layout: W [out, in], b [out]

    f32 = jnp.float32
    bf16 = jnp.bfloat16

    # Kernel-side weight layouts (transposed-activation orientation).
    w1k = W1.astype(f32).reshape(HID, 1)       # [256, 1]
    b1k = b1.astype(f32).reshape(HID, 1)       # [256, 1]
    w2k = W2.astype(bf16)                      # [256, 256]  (out, in)
    b2k = b2.astype(act_dtype).reshape(HID, 1)
    w3k = W3.astype(bf16)                      # [256, 256]
    b3k = b3.astype(act_dtype).reshape(HID, 1)
    w4k = W4.astype(f32).reshape(HID, 1)       # [256, 1]
    b4k = b4.astype(f32).reshape(1, 1)         # [1, 1]

    # Lane-dense, padded batch layout: [1, B_pad] with bt a multiple of 128.
    bt = max(128, min(int(batch_tile), _round_up(B, 128)))
    bt = _round_up(bt, 128)
    B_pad = _round_up(B, bt)
    xr = x.reshape(B).astype(f32)
    xt = jnp.pad(xr, (0, B_pad - B)).reshape(1, B_pad)

    grid = (B_pad // bt,)

    kernel = functools.partial(escape_mlp_kernel, act_dtype=act_dtype)

    def _resident(a):
        # Constant block index -> weight stays resident in VMEM across grid steps.
        nd = a.ndim
        return pl.BlockSpec(a.shape, lambda i, _nd=nd: (0,) * _nd)

    # Scoped VMEM sized from the tile (resident weights + pipelined x/o buffers
    # + generous headroom for f32/bf16 activation temporaries and spills).
    vmem_limit = int(min(56 << 20, (6 << 20) + 16 * HID * bt * 4))

    flops = int(B_pad) * (2 * DIM * HID + 2 * 2 * HID * HID + 2 * HID)
    cost = pl.CostEstimate(
        flops=flops,
        transcendentals=int(B_pad),
        bytes_accessed=int(8 * B_pad + 2 * 2 * HID * HID + 8 * HID * 4),
    )

    out_t = pl.pallas_call(
        kernel,
        out_shape=jax.ShapeDtypeStruct((1, B_pad), f32),
        grid=grid,
        in_specs=[
            pl.BlockSpec((1, bt), lambda i: (0, i)),       # x: pipelined over batch
            _resident(w1k), _resident(b1k),
            _resident(w2k), _resident(b2k),
            _resident(w3k), _resident(b3k),
            _resident(w4k), _resident(b4k),
        ],
        out_specs=pl.BlockSpec((1, bt), lambda i: (0, i)),  # lane-dense output block
        compiler_params=pltpu.CompilerParams(
            dimension_semantics=("parallel",),              # v7x: split batch over 2 TCs
            vmem_limit_bytes=vmem_limit,
        ),
        cost_estimate=cost,
    )(xt, w1k, b1k, w2k, b2k, w3k, b3k, w4k, b4k)

    return out_t.reshape(B_pad, 1)[:B]


def init_params(key):
    """PyTorch-layout params; nn.Linear default init U(-1/sqrt(fan_in), +1/sqrt(fan_in))."""
    ks = jax.random.split(key, 8)

    def lin(kw, kb, fan_in, fan_out):
        bound = float(fan_in) ** -0.5
        W = jax.random.uniform(kw, (fan_out, fan_in), jnp.float32, -bound, bound)
        b = jax.random.uniform(kb, (fan_out,), jnp.float32, -bound, bound)
        return W, b

    W1, b1 = lin(ks[0], ks[1], DIM, HID)          # [256, 1], [256]
    W2, b2 = lin(ks[2], ks[3], HID, HID)          # [256, 256], [256]
    W3, b3 = lin(ks[4], ks[5], HID, HID)          # [256, 256], [256]
    W4, b4 = lin(ks[6], ks[7], HID, 1)            # [1, 256],   [1]
    return (W1, b1, W2, b2, W3, b3, W4, b4)


def reference_forward_f32(x, params):
    """Full-precision reference matching the original PyTorch module (eval mode)."""
    W1, b1, W2, b2, W3, b3, W4, b4 = params
    h = _leaky_relu(x @ W1.T + b1)
    h = _leaky_relu(h @ W2.T + b2)
    h = _leaky_relu(h @ W3.T + b3)
    return jax.nn.sigmoid(h @ W4.T + b4)


def reference_forward_matched(x, params, act_dtype):
    """Reference applying the exact same dtype casts / op order as the kernel."""
    W1, b1, W2, b2, W3, b3, W4, b4 = params
    f32, bf16 = jnp.float32, jnp.bfloat16
    h = _leaky_relu(x @ W1.T + b1)                                   # f32
    h = h.astype(bf16)
    a = jnp.dot(h, W2.astype(bf16).T, preferred_element_type=f32)
    h = _leaky_relu(a.astype(act_dtype) + b2.astype(act_dtype))
    h = h.astype(bf16)
    a = jnp.dot(h, W3.astype(bf16).T, preferred_element_type=f32)
    h = _leaky_relu(a.astype(act_dtype) + b3.astype(act_dtype))
    z = jnp.sum(h.astype(f32) * W4.astype(f32), axis=-1, keepdims=True) + b4
    return jax.nn.sigmoid(z)


if __name__ == "__main__":
    key = jax.random.PRNGKey(0)
    k_param, k_x1, k_x2 = jax.random.split(key, 3)

    params = init_params(k_param)
    act_dtype = _default_act_dtype()

    # --- Small batch: exercises the padding path (B=8 -> one 128-lane tile). ---
    B1 = 8
    x1 = jax.random.normal(k_x1, (B1, DIM), jnp.float32)
    out1 = jax.block_until_ready(escape_model_forward(x1, params, act_dtype=act_dtype))
    assert out1.shape == (B1, 1)

    ref1_m = reference_forward_matched(x1, params, act_dtype)
    assert jnp.allclose(out1, ref1_m, atol=5e-3, rtol=5e-3), (out1, ref1_m)
    ref1_f = reference_forward_f32(x1, params)
    assert jnp.allclose(out1, ref1_f, atol=3e-2, rtol=3e-2), (out1, ref1_f)

    # --- Multi-tile grid with ragged remainder: exercises tiling, padding,
    #     resident weights across grid steps, and the parallel batch axis. ---
    B2 = 1000
    x2 = jax.random.normal(k_x2, (B2, DIM), jnp.float32)
    out2 = jax.block_until_ready(
        escape_model_forward(x2, params, batch_tile=256, act_dtype=act_dtype))
    assert out2.shape == (B2, 1)

    ref2_m = reference_forward_matched(x2, params, act_dtype)
    assert jnp.allclose(out2, ref2_m, atol=5e-3, rtol=5e-3)
    ref2_f = reference_forward_f32(x2, params)
    assert jnp.allclose(out2, ref2_f, atol=3e-2, rtol=3e-2)

    print("KERNEL_OK")
</pallas_src>

<mosaic_0001>
module attributes {stable_mosaic.version = 11 : i64} {
  func.func @escape_mlp_kernel(%arg0: i32, %arg1: memref<1x128xf32, #tpu.memory_space<vmem>>, %arg2: memref<256x1xf32, #tpu.memory_space<vmem>>, %arg3: memref<256x1xf32, #tpu.memory_space<vmem>>, %arg4: memref<256x256xbf16, #tpu.memory_space<vmem>>, %arg5: memref<256x1xbf16, #tpu.memory_space<vmem>>, %arg6: memref<256x256xbf16, #tpu.memory_space<vmem>>, %arg7: memref<256x1xbf16, #tpu.memory_space<vmem>>, %arg8: memref<256x1xf32, #tpu.memory_space<vmem>>, %arg9: memref<1x1xf32, #tpu.memory_space<vmem>>, %arg10: memref<1x128xf32, #tpu.memory_space<vmem>>) attributes {dimension_semantics = [#tpu.dimension_semantics<parallel>], iteration_bounds = array<i64: 1>, scalar_prefetch = 0 : i64, scratch_operands = 0 : i64, tpu.core_type = #tpu.core_type<tc>, window_params = [{transform_indices = @transform_0, window_bounds = array<i64: 1, 128>}, {pipeline_mode = #tpu.pipeline_mode<synchronous>, transform_indices = @transform_1, window_bounds = array<i64: 256, 1>}, {pipeline_mode = #tpu.pipeline_mode<synchronous>, transform_indices = @transform_2, window_bounds = array<i64: 256, 1>}, {pipeline_mode = #tpu.pipeline_mode<synchronous>, transform_indices = @transform_3, window_bounds = array<i64: 256, 256>}, {pipeline_mode = #tpu.pipeline_mode<synchronous>, transform_indices = @transform_4, window_bounds = array<i64: 256, 1>}, {pipeline_mode = #tpu.pipeline_mode<synchronous>, transform_indices = @transform_5, window_bounds = array<i64: 256, 256>}, {pipeline_mode = #tpu.pipeline_mode<synchronous>, transform_indices = @transform_6, window_bounds = array<i64: 256, 1>}, {pipeline_mode = #tpu.pipeline_mode<synchronous>, transform_indices = @transform_7, window_bounds = array<i64: 256, 1>}, {pipeline_mode = #tpu.pipeline_mode<synchronous>, transform_indices = @transform_8, window_bounds = array<i64: 1, 1>}, {transform_indices = @transform_9, window_bounds = array<i64: 1, 128>}]} {
    %c0 = arith.constant 0 : index
    %c0_0 = arith.constant 0 : index
    %0 = vector.load %arg1[%c0, %c0_0] : memref<1x128xf32, #tpu.memory_space<vmem>>, vector<1x128xf32>
    %c0_1 = arith.constant 0 : index
    %c0_2 = arith.constant 0 : index
    %1 = vector.load %arg2[%c0_1, %c0_2] : memref<256x1xf32, #tpu.memory_space<vmem>>, vector<256x1xf32>
    %2 = vector.broadcast %1 : vector<256x1xf32> to vector<256x128xf32>
    %3 = vector.broadcast %0 : vector<1x128xf32> to vector<256x128xf32>
    %4 = arith.mulf %2, %3 : vector<256x128xf32>
    %c0_3 = arith.constant 0 : index
    %c0_4 = arith.constant 0 : index
    %5 = vector.load %arg3[%c0_3, %c0_4] : memref<256x1xf32, #tpu.memory_space<vmem>>, vector<256x1xf32>
    %6 = vector.broadcast %5 : vector<256x1xf32> to vector<256x128xf32>
    %7 = arith.addf %4, %6 : vector<256x128xf32>
    %cst = arith.constant 0.00999999977 : f32
    %8 = vector.broadcast %cst : f32 to vector<256x128xf32>
    %9 = arith.mulf %8, %7 : vector<256x128xf32>
    %10 = arith.maximumf %7, %9 : vector<256x128xf32>
    %11 = arith.truncf %10 : vector<256x128xf32> to vector<256x128xbf16>
    %c0_5 = arith.constant 0 : index
    %c0_6 = arith.constant 0 : index
    %12 = vector.load %arg4[%c0_5, %c0_6] : memref<256x256xbf16, #tpu.memory_space<vmem>>, vector<256x256xbf16>
    %cst_7 = arith.constant dense<0.000000e+00> : vector<256x128xf32>
    %13 = tpu.matmul %12, %11, %cst_7 {dimension_numbers = #tpu.dot_dimension_numbers<[1], [0], [0], [1], [0, 0, 1, 1], [], []>} : vector<256x256xbf16>, vector<256x128xbf16>, vector<256x128xf32> -> vector<256x128xf32>
    %14 = arith.truncf %13 : vector<256x128xf32> to vector<256x128xbf16>
    %c0_8 = arith.constant 0 : index
    %c0_9 = arith.constant 0 : index
    %15 = vector.load %arg5[%c0_8, %c0_9] : memref<256x1xbf16, #tpu.memory_space<vmem>>, vector<256x1xbf16>
    %16 = vector.broadcast %15 : vector<256x1xbf16> to vector<256x128xbf16>
    %17 = arith.addf %14, %16 : vector<256x128xbf16>
    %cst_10 = arith.constant 1.000980e-02 : bf16
    %18 = vector.broadcast %cst_10 : bf16 to vector<256x128xbf16>
    %19 = arith.mulf %18, %17 : vector<256x128xbf16>
    %20 = arith.maximumf %17, %19 : vector<256x128xbf16>
    %c0_11 = arith.constant 0 : index
    %c0_12 = arith.constant 0 : index
    %21 = vector.load %arg6[%c0_11, %c0_12] : memref<256x256xbf16, #tpu.memory_space<vmem>>, vector<256x256xbf16>
    %cst_13 = arith.constant dense<0.000000e+00> : vector<256x128xf32>
    %22 = tpu.matmul %21, %20, %cst_13 {dimension_numbers = #tpu.dot_dimension_numbers<[1], [0], [0], [1], [0, 0, 1, 1], [], []>} : vector<256x256xbf16>, vector<256x128xbf16>, vector<256x128xf32> -> vector<256x128xf32>
    %23 = arith.truncf %22 : vector<256x128xf32> to vector<256x128xbf16>
    %c0_14 = arith.constant 0 : index
    %c0_15 = arith.constant 0 : index
    %24 = vector.load %arg7[%c0_14, %c0_15] : memref<256x1xbf16, #tpu.memory_space<vmem>>, vector<256x1xbf16>
    %25 = vector.broadcast %24 : vector<256x1xbf16> to vector<256x128xbf16>
    %26 = arith.addf %23, %25 : vector<256x128xbf16>
    %cst_16 = arith.constant 1.000980e-02 : bf16
    %27 = vector.broadcast %cst_16 : bf16 to vector<256x128xbf16>
    %28 = arith.mulf %27, %26 : vector<256x128xbf16>
    %29 = arith.maximumf %26, %28 : vector<256x128xbf16>
    %30 = arith.extf %29 : vector<256x128xbf16> to vector<256x128xf32>
    %c0_17 = arith.constant 0 : index
    %c0_18 = arith.constant 0 : index
    %31 = vector.load %arg8[%c0_17, %c0_18] : memref<256x1xf32, #tpu.memory_space<vmem>>, vector<256x1xf32>
    %32 = vector.broadcast %31 : vector<256x1xf32> to vector<256x128xf32>
    %33 = arith.mulf %30, %32 : vector<256x128xf32>
    %cst_19 = arith.constant dense<0.000000e+00> : vector<128xf32>
    %34 = vector.multi_reduction <add>, %33, %cst_19 [0] : vector<256x128xf32> to vector<128xf32>
    %35 = vector.shape_cast %34 : vector<128xf32> to vector<1x128xf32>
    %c0_20 = arith.constant 0 : index
    %c0_21 = arith.constant 0 : index
    %36 = vector.load %arg9[%c0_20, %c0_21] : memref<1x1xf32, #tpu.memory_space<vmem>>, vector<1x1xf32>
    %37 = vector.broadcast %36 : vector<1x1xf32> to vector<1x128xf32>
    %38 = arith.addf %35, %37 : vector<1x128xf32>
    %cst_22 = arith.constant 0.000000e+00 : f32
    %39 = vector.broadcast %cst_22 : f32 to vector<1x128xf32>
    %40 = arith.cmpf oge, %38, %39 : vector<1x128xf32>
    %cst_23 = arith.constant 0.000000e+00 : f32
    %41 = vector.broadcast %cst_23 : f32 to vector<1x128xf32>
    %42 = arith.subf %41, %38 : vector<1x128xf32>
    %43 = arith.select %40, %42, %38 : vector<1x128xi1>, vector<1x128xf32>
    %44 = math.exp %43 : vector<1x128xf32>
    %cst_24 = arith.constant 1.000000e+00 : f32
    %45 = vector.broadcast %cst_24 : f32 to vector<1x128xf32>
    %46 = arith.select %40, %45, %44 : vector<1x128xi1>, vector<1x128xf32>
    %cst_25 = arith.constant 1.000000e+00 : f32
    %47 = vector.broadcast %cst_25 : f32 to vector<1x128xf32>
    %48 = arith.addf %47, %44 : vector<1x128xf32>
    %49 = arith.divf %46, %48 : vector<1x128xf32>
    %c0_26 = arith.constant 0 : index
    %c0_27 = arith.constant 0 : index
    %50 = vector.load %arg10[%c0_26, %c0_27] : memref<1x128xf32, #tpu.memory_space<vmem>>, vector<1x128xf32>
    tpu.vector_store %arg10[%c0_26, %c0_27], %49 {strides = array<i32>} : memref<1x128xf32, #tpu.memory_space<vmem>>, vector<1x128xf32>,
    return
  }
  func.func @transform_0(%arg0: i32) -> (i32, i32) {
    %c0_i32 = arith.constant 0 : i32
    %c0_i32_0 = arith.constant 0 : i32
    return %c0_i32, %arg0 : i32, i32
  }
  func.func @transform_1(%arg0: i32) -> (i32, i32) {
    %c0_i32 = arith.constant 0 : i32
    %c0_i32_0 = arith.constant 0 : i32
    %c0_i32_1 = arith.constant 0 : i32
    return %c0_i32, %c0_i32_0 : i32, i32
  }
  func.func @transform_2(%arg0: i32) -> (i32, i32) {
    %c0_i32 = arith.constant 0 : i32
    %c0_i32_0 = arith.constant 0 : i32
    %c0_i32_1 = arith.constant 0 : i32
    return %c0_i32, %c0_i32_0 : i32, i32
  }
  func.func @transform_3(%arg0: i32) -> (i32, i32) {
    %c0_i32 = arith.constant 0 : i32
    %c0_i32_0 = arith.constant 0 : i32
    %c0_i32_1 = arith.constant 0 : i32
    return %c0_i32, %c0_i32_0 : i32, i32
  }
  func.func @transform_4(%arg0: i32) -> (i32, i32) {
    %c0_i32 = arith.constant 0 : i32
    %c0_i32_0 = arith.constant 0 : i32
    %c0_i32_1 = arith.constant 0 : i32
    return %c0_i32, %c0_i32_0 : i32, i32
  }
  func.func @transform_5(%arg0: i32) -> (i32, i32) {
    %c0_i32 = arith.constant 0 : i32
    %c0_i32_0 = arith.constant 0 : i32
    %c0_i32_1 = arith.constant 0 : i32
    return %c0_i32, %c0_i32_0 : i32, i32
  }
  func.func @transform_6(%arg0: i32) -> (i32, i32) {
    %c0_i32 = arith.constant 0 : i32
    %c0_i32_0 = arith.constant 0 : i32
    %c0_i32_1 = arith.constant 0 : i32
    return %c0_i32, %c0_i32_0 : i32, i32
  }
  func.func @transform_7(%arg0: i32) -> (i32, i32) {
    %c0_i32 = arith.constant 0 : i32
    %c0_i32_0 = arith.constant 0 : i32
    %c0_i32_1 = arith.constant 0 : i32
    return %c0_i32, %c0_i32_0 : i32, i32
  }
  func.func @transform_8(%arg0: i32) -> (i32, i32) {
    %c0_i32 = arith.constant 0 : i32
    %c0_i32_0 = arith.constant 0 : i32
    %c0_i32_1 = arith.constant 0 : i32
    return %c0_i32, %c0_i32_0 : i32, i32
  }
  func.func @transform_9(%arg0: i32) -> (i32, i32) {
    %c0_i32 = arith.constant 0 : i32
    %c0_i32_0 = arith.constant 0 : i32
    return %c0_i32, %arg0 : i32, i32
  }
}

</mosaic_0001>

<bundles_post_ra>
// kernel: tpu_custom_call.1
= control target key start
LH: loop header
LB: loop body
LE: loop exit
PB: predicated region body
PF: predicated region fallthrough
CT: control target
= control target key end

     0   :  { %s4605_s0 = inlined_call_operand.vmem [shape: f32[1,128], index: 0, kind: input, shape index: {}]   ;;  %s4606_s1 = inlined_call_operand.vmem [shape: f32[256,1], index: 1, kind: input, shape index: {}]   ;;  %s4607_s2 = inlined_call_operand.vmem [shape: f32[256,1], index: 2, kind: input, shape index: {}]   ;;  %s4608_s3 = inlined_call_operand.vmem [shape: bf16[256,256], index: 3, kind: input, shape index: {}]   ;;  %s4609_s4 = inlined_call_operand.vmem [shape: bf16[256,1], index: 4, kind: input, shape index: {}]   ;;  %s4610_s5 = inlined_call_operand.vmem [shape: bf16[256,256], index: 5, kind: input, shape index: {}]   ;;  %s4611_s6 = inlined_call_operand.vmem [shape: bf16[256,1], index: 6, kind: input, shape index: {}]   ;;  %s4612_s7 = inlined_call_operand.vmem [shape: f32[256,1], index: 7, kind: input, shape index: {}]   ;;  %s4613_s8 = inlined_call_operand.<no memory space> [shape: f32[1,1], index: 8, kind: input, shape index: {}]   ;;  %s4614_s9 = inlined_call_operand.hbm [shape: f32[1,128], index: 9, kind: output, shape index: {}]  }
   0x1   :  { %v14_v0 = vstv %s4613_s8 }
   0x2   :  { %15 = vst [vmem:[#allocation2] sm:$0x1] %v14_v0 }
   0x3   :  { %v66_v1 = vld [vmem:[%s4606_s1 + $0xf0] sm:$0xff]  ;;  %v36_v3 = vld [vmem:[%s4606_s1] sm:$0xff]  ;;  %v3332_v4 = vmov 0  }
   0x4   :  { %v50_v2 = vld [vmem:[%s4606_s1 + $0x70] sm:$0xff]  ;;  %3300 = vset.pattern.permute.xlu2 %v3332_v4  ;;  %3299 = vset.pattern.permute.xlu1 %v3332_v4 }
   0x5   :  { %3298 = vset.pattern.permute.xlu0 %v3332_v4  ;;  %220 = vperm.xlu2 %3300, %v66_v1  }
   0x6   :  { %140 = vperm.xlu1 %3299, %v50_v2   ;;  %70 = vperm.xlu0 %3298, %v36_v3  }
   0x7   :  { %16 = vsyncpa [#allocation4], 0  ;;  %v67_v5 = vld [vmem:[%s4606_s1 + $0xf8] sm:$0xff]  ;;  %v37_v7 = vld [vmem:[%s4606_s1 + $0x8] sm:$0xff]  ;;  %s2966_s18 = sshll.u32 %s4614_s9, 4  ;;  %s2967_s18 = int_to_ptr.hbm [resolvable:$true] %s2966_s18 }
   0x8   :  { %v51_v6 = vld [vmem:[%s4606_s1 + $0x78] sm:$0xff]  ;;  %v293_v8 = vld [vmem:[%s4607_s2 + $0xf0] sm:$0xff]  ;;  %v49_v11 = vld [vmem:[%s4606_s1 + $0x68] sm:$0xff] }
   0x9   :  { %v278_v9 = vld [vmem:[%s4607_s2 + $0x78] sm:$0xff]  ;;  %v277_v10 = vld [vmem:[%s4607_s2 + $0x70] sm:$0xff]  ;;  %v48_v12 = vld [vmem:[%s4606_s1 + $0x60] sm:$0xff] }
   0xa   :  { %v294_v13 = vld [vmem:[%s4607_s2 + $0xf8] sm:$0xff]  ;;  %v275_v14 = vld [vmem:[%s4607_s2 + $0x60] sm:$0xff]  ;;  %v65_v15 = vld [vmem:[%s4606_s1 + $0xe8] sm:$0xff] }
   0xb   :  { %v64_v16 = vld [vmem:[%s4606_s1 + $0xe0] sm:$0xff]  ;;  %v292_v17 = vld [vmem:[%s4607_s2 + $0xe8] sm:$0xff]  ;;  %v62_v20 = vld [vmem:[%s4606_s1 + $0xd0] sm:$0xff] }
   0xc   :  { %v291_v18 = vld [vmem:[%s4607_s2 + $0xe0] sm:$0xff]  ;;  %v276_v19 = vld [vmem:[%s4607_s2 + $0x68] sm:$0xff]  ;;  %v47_v21 = vld [vmem:[%s4606_s1 + $0x58] sm:$0xff] }
   0xd   :  { %225 = vperm.xlu2 %3300, %v67_v5   ;;  %v46_v22 = vld [vmem:[%s4606_s1 + $0x50] sm:$0xff]  ;;  %v274_v23 = vld [vmem:[%s4607_s2 + $0x58] sm:$0xff]  ;;  %v44_v26 = vld [vmem:[%s4606_s1 + $0x40] sm:$0xff] }
   0xe   :  { %145 = vperm.xlu1 %3299, %v51_v6   ;;  %75 = vperm.xlu0 %3298, %v37_v7   ;;  %v273_v24 = vld [vmem:[%s4607_s2 + $0x50] sm:$0xff]  ;;  %v63_v25 = vld [vmem:[%s4606_s1 + $0xd8] sm:$0xff]  ;;  %v61_v29 = vld [vmem:[%s4606_s1 + $0xc8] sm:$0xff] }
   0xf   :  { %v290_v27 = vld [vmem:[%s4607_s2 + $0xd8] sm:$0xff]  ;;  %v289_v28 = vld [vmem:[%s4607_s2 + $0xd0] sm:$0xff]  ;;  %v60_v30 = vld [vmem:[%s4606_s1 + $0xc0] sm:$0xff] }
  0x10   :  { %v45_v31 = vld [vmem:[%s4606_s1 + $0x48] sm:$0xff]  ;;  %v287_v32 = vld [vmem:[%s4607_s2 + $0xc0] sm:$0xff]  ;;  %v43_v35 = vld [vmem:[%s4606_s1 + $0x38] sm:$0xff] }
  0x11   :  { %v272_v33 = vld [vmem:[%s4607_s2 + $0x48] sm:$0xff]  ;;  %v271_v34 = vld [vmem:[%s4607_s2 + $0x40] sm:$0xff]  ;;  %v42_v36 = vld [vmem:[%s4606_s1 + $0x30] sm:$0xff] }
  0x12   :  { %v288_v37 = vld [vmem:[%s4607_s2 + $0xc8] sm:$0xff]  ;;  %v269_v39 = vld [vmem:[%s4607_s2 + $0x30] sm:$0xff]  ;;  %v59_v40 = vld [vmem:[%s4606_s1 + $0xb8] sm:$0xff] }
  0x13   :  { %v58_v41 = vld [vmem:[%s4606_s1 + $0xb0] sm:$0xff]  ;;  %v286_v43 = vld [vmem:[%s4607_s2 + $0xb8] sm:$0xff]  ;;  %v56_v47 = vld [vmem:[%s4606_s1 + $0xa0] sm:$0xff] }
  0x14   :  { %v285_v44 = vld [vmem:[%s4607_s2 + $0xb0] sm:$0xff]  ;;  %v270_v45 = vld [vmem:[%s4607_s2 + $0x38] sm:$0xff]  ;;  %v41_v48 = vld [vmem:[%s4606_s1 + $0x28] sm:$0xff] }
  0x15   :  { %447 = vperm.xlu2 %3300, %v293_v8   ;;  %v40_v49 = vld [vmem:[%s4606_s1 + $0x20] sm:$0xff]  ;;  %v268_v53 = vld [vmem:[%s4607_s2 + $0x28] sm:$0xff]  ;;  %v38_v59 = vld [vmem:[%s4606_s1 + $0x10] sm:$0xff] }
  0x16   :  { %372 = vperm.xlu1 %3299, %v278_v9   ;;  %367 = vperm.xlu0 %3298, %v277_v10   ;;  %v267_v54 = vld [vmem:[%s4607_s2 + $0x20] sm:$0xff]  ;;  %v57_v55 = vld [vmem:[%s4606_s1 + $0xa8] sm:$0xff]  ;;  %v55_v7 = vld [vmem:[%s4606_s1 + $0x98] sm:$0xff] }
  0x17   :  { %v284_v60 = vld [vmem:[%s4607_s2 + $0xa8] sm:$0xff]  ;;  %v283_v61 = vld [vmem:[%s4607_s2 + $0xa0] sm:$0xff]  ;;  %v54_v10 = vld [vmem:[%s4606_s1 + $0x90] sm:$0xff] }
  0x18   :  { %v3550_v62 = vld [vmem:[%s4605_s0] ss:$0 sm:$0xff] }
  0x1d   :  { %135 = vperm.xlu2 %3300, %v49_v11   ;;  %v39_v11 = vld [vmem:[%s4606_s1 + $0x18] sm:$0xff] }
  0x1e   :  { %130 = vperm.xlu1 %3299, %v48_v12   ;;  %452 = vperm.xlu0 %3298, %v294_v13  }
  0x25   :  { %357 = vperm.xlu2 %3300, %v275_v14  }
  0x26   :  { %215 = vperm.xlu1 %3299, %v65_v15   ;;  %210 = vperm.xlu0 %3298, %v64_v16  }
  0x2d   :  { %442 = vperm.xlu2 %3300, %v292_v17  }
  0x2e   :  { %437 = vperm.xlu1 %3299, %v291_v18   ;;  %362 = vperm.xlu0 %3298, %v276_v19  }
  0x35   :  { %200 = vperm.xlu2 %3300, %v62_v20  }
  0x36   :  { %125 = vperm.xlu1 %3299, %v47_v21   ;;  %120 = vperm.xlu0 %3298, %v46_v22   ;;  %v281_v22 = vld [vmem:[%s4607_s2 + $0x90] sm:$0xff] }
  0x3d   :  { %352 = vperm.xlu2 %3300, %v274_v23  }
  0x3e   :  { %347 = vperm.xlu1 %3299, %v273_v24   ;;  %205 = vperm.xlu0 %3298, %v63_v25   ;;  %v266_v24 = vld [vmem:[%s4607_s2 + $0x18] sm:$0xff]  ;;  %v265_v25 = vld [vmem:[%s4607_s2 + $0x10] sm:$0xff] }
  0x45   :  { %110 = vperm.xlu2 %3300, %v44_v26  }
  0x46   :  { %432 = vperm.xlu1 %3299, %v290_v27   ;;  %427 = vperm.xlu0 %3298, %v289_v28  }
  0x4d   :  { %195 = vperm.xlu2 %3300, %v61_v29  }
  0x4e   :  { %190 = vperm.xlu1 %3299, %v60_v30   ;;  %115 = vperm.xlu0 %3298, %v45_v31  }
  0x55   :  { %417 = vperm.xlu2 %3300, %v287_v32  }
  0x56   :  { %342 = vperm.xlu1 %3299, %v272_v33   ;;  %337 = vperm.xlu0 %3298, %v271_v34   ;;  %v53_v34 = vld [vmem:[%s4606_s1 + $0x88] sm:$0xff] }
  0x5d   :  { %105 = vperm.xlu2 %3300, %v43_v35   ;;  %v52_v35 = vld [vmem:[%s4606_s1 + $0x80] sm:$0xff] }
  0x5e   :  { %100 = vperm.xlu1 %3299, %v42_v36   ;;  %422 = vperm.xlu0 %3298, %v288_v37   ;;  %v282_v36 = vld [vmem:[%s4607_s2 + $0x98] sm:$0xff] }
  0x5f   :  { %v221_v38 = vpop.permute.xlu2 %220 }
  0x60   :  { %v261_v4 = vmul.f32 %v3550_v62, %v221_v38 }
  0x65   :  { %327 = vperm.xlu2 %3300, %v269_v39  }
  0x66   :  { %185 = vperm.xlu1 %3299, %v59_v40   ;;  %180 = vperm.xlu0 %3298, %v58_v41  }
  0x67   :  { %v226_v42 = vpop.permute.xlu2 %225 }
  0x68   :  { %v262_v15 = vmul.f32 %v3550_v62, %v226_v42 }
  0x6d   :  { %412 = vperm.xlu2 %3300, %v286_v43  }
  0x6e   :  { %407 = vperm.xlu1 %3299, %v285_v44   ;;  %332 = vperm.xlu0 %3298, %v270_v45  }
  0x6f   :  { %v448_v46 = vpop.permute.xlu2 %447 }
  0x70   :  { %v485_v12 = vadd.f32 %v448_v46, %v261_v4 }
  0x72   :  { %v517_v20 = vmul.f32 0.01, %v485_v12 }
  0x74   :  { %v549_v26 = vmax.f32 %v485_v12, %v517_v20 }
  0x75   :  { %170 = vperm.xlu2 %3300, %v56_v47   ;;  %v279_v47 = vld [vmem:[%s4607_s2 + $0x80] sm:$0xff] }
  0x76   :  { %95 = vperm.xlu1 %3299, %v41_v48   ;;  %90 = vperm.xlu0 %3298, %v40_v49  }
  0x77   :  { %v3523_v50 = vpop.permute.xlu2 %135 }
  0x78   :  { %v141_v51 = vpop.permute.xlu1 %140  ;;  %v3525_v52 = vpop.permute.xlu0 %70  ;;  %v244_v39 = vmul.f32 %v3550_v62, %v3523_v50  ;;  %v264_v50 = vld [vmem:[%s4607_s2 + $0x8] sm:$0xff] }
  0x79   :  { %v245_v63 = vmul.f32 %v3550_v62, %v141_v51 }
  0x7d   :  { %322 = vperm.xlu2 %3300, %v268_v53   ;;  %v263_v53 = vld [vmem:[%s4607_s2] sm:$0xff] }
  0x7e   :  { %317 = vperm.xlu1 %3299, %v267_v54   ;;  %175 = vperm.xlu0 %3298, %v57_v55  }
  0x7f   :  { %v358_v56 = vpop.permute.xlu2 %357 }
  0x80   :  { %v146_v57 = vpop.permute.xlu1 %145  ;;  %v3536_v58 = vpop.permute.xlu0 %75 }
  0x81   :  { %v246_v0 = vmul.f32 %v3550_v62, %v146_v57 }
  0x85   :  { %80 = vperm.xlu2 %3300, %v38_v59  }
  0x86   :  { %402 = vperm.xlu1 %3299, %v284_v60   ;;  %397 = vperm.xlu0 %3298, %v283_v61  }
  0x87   :  { %v443_v1 = vpop.permute.xlu2 %442 }
  0x88   :  { %v373_v2 = vpop.permute.xlu1 %372  ;;  %v368_v3 = vpop.permute.xlu0 %367 }
  0x89   :  { %v470_v5 = vadd.f32 %v373_v2, %v246_v0  ;;  %v469_v6 = vadd.f32 %v368_v3, %v245_v63  ;;  %v969_v2 = vld [vmem:[%s4609_s4] sm:$0xf]  ;;  %v280_v3 = vld [vmem:[%s4607_s2 + $0x88] sm:$0xff] }
  0x8b   :  { %v502_v8 = vmul.f32 0.01, %v470_v5  ;;  %v501_v9 = vmul.f32 0.01, %v469_v6 }
  0x8d   :  { %165 = vperm.xlu2 %3300, %v55_v7   ;;  %v533_v13 = vmax.f32 %v469_v6, %v501_v9  ;;  %v534_v14 = vmax.f32 %v470_v5, %v502_v8 }
  0x8e   :  { %160 = vperm.xlu1 %3299, %v54_v10   ;;  %85 = vperm.xlu0 %3298, %v39_v11   ;;  %v973_v11 = vld [vmem:[%s4609_s4 + $0x10] sm:$0xf] }
  0x8f   :  { %v3565_v16 = vpop.permute.xlu2 %200  ;;  %v558_v17 = vpack.c.bf16 %v534_v14, %v533_v13  ;;  %v972_v13 = vld [vmem:[%s4609_s4 + $0xc] sm:$0xf]  ;;  %v971_v14 = vld [vmem:[%s4609_s4 + $0x8] sm:$0xf] }
  0x90   :  { %v131_v18 = vpop.permute.xlu1 %130  ;;  %v453_v19 = vpop.permute.xlu0 %452 }
  0x91   :  { %v486_v21 = vadd.f32 %v453_v19, %v262_v15  ;;  %759 = vmatpush.bf16.msra.mxu0 %v558_v17  ;;  %v243_v31 = vmul.f32 %v3550_v62, %v131_v18  ;;  %v257_v18 = vmul.f32 %v3550_v62, %v3565_v16  ;;  %v974_v16 = vld [vmem:[%s4609_s4 + $0x14] sm:$0xf] }
  0x93   :  { %v518_v23 = vmul.f32 0.01, %v486_v21  ;;  %v467_v37 = vadd.f32 %v358_v56, %v243_v31 }
  0x95   :  { %387 = vperm.xlu2 %3300, %v281_v22   ;;  %v550_v27 = vmax.f32 %v486_v21, %v518_v23  ;;  %v499_v45 = vmul.f32 0.01, %v467_v37 }
  0x96   :  { %312 = vperm.xlu1 %3299, %v266_v24   ;;  %307 = vperm.xlu0 %3298, %v265_v25  }
  0x97   :  { %v566_v28 = vpack.c.bf16 %v550_v27, %v549_v26  ;;  %v353_v32 = vpop.permute.xlu2 %352  ;;  %v531_v56 = vmax.f32 %v467_v37, %v499_v45  ;;  %v975_v26 = vld [vmem:[%s4609_s4 + $0x18] sm:$0xf]  ;;  %v976_v27 = vld [vmem:[%s4609_s4 + $0x1c] sm:$0xf] }
  0x98   :  { %v216_v29 = vpop.permute.xlu1 %215  ;;  %v211_v30 = vpop.permute.xlu0 %210  ;;  %v984_v37 = vld [vmem:[%s4609_s4 + $0x3c] sm:$0xf] }
  0x99   :  { %v260_v33 = vmul.f32 %v3550_v62, %v216_v29  ;;  %848 = vmatpush.bf16.msra.mxu1 %v566_v28  ;;  %v259_v40 = vmul.f32 %v3550_v62, %v211_v30 }
  0x9b   :  { %v484_v38 = vadd.f32 %v443_v1, %v260_v33  ;;  %v970_v1 = vld [vmem:[%s4609_s4 + $0x4] sm:$0xf] }
  0x9d   :  { %155 = vperm.xlu2 %3300, %v53_v34   ;;  %v516_v46 = vmul.f32 0.01, %v484_v38 }
  0x9e   :  { %150 = vperm.xlu1 %3299, %v52_v35   ;;  %392 = vperm.xlu0 %3298, %v282_v36   ;;  %v999_v36 = vld [vmem:[%s4609_s4 + $0x78] sm:$0xf] }
  0x9f   :  { %v3593_v49 = vpop.permute.xlu2 %110  ;;  %v548_v57 = vmax.f32 %v484_v38, %v516_v46  ;;  %v983_v38 = vld [vmem:[%s4609_s4 + $0x38] sm:$0xf]  ;;  %v981_v46 = vld [vmem:[%s4609_s4 + $0x30] sm:$0xf] }
  0xa0   :  { %v438_v41 = vpop.permute.xlu1 %437  ;;  %v363_v42 = vpop.permute.xlu0 %362 }
  0xa1   :  { %v483_v43 = vadd.f32 %v438_v41, %v259_v40  ;;  %v468_v44 = vadd.f32 %v363_v42, %v244_v39  ;;  %v239_v39 = vmul.f32 %v3550_v62, %v3593_v49  ;;  %v1000_v49 = vld [vmem:[%s4609_s4 + $0x7c] sm:$0xf] }
  0xa3   :  { %v515_v48 = vmul.f32 0.01, %v483_v43  ;;  %v500_v51 = vmul.f32 0.01, %v468_v44 }
  0xa5   :  { %v547_v54 = vmax.f32 %v483_v43, %v515_v48  ;;  %v532_v55 = vmax.f32 %v468_v44, %v500_v51  ;;  %377 = vperm.xlu2 %3300, %v279_v47   ;;  %v982_v47 = vld [vmem:[%s4609_s4 + $0x34] sm:$0xf] }
  0xa6   :  { %302 = vperm.xlu1 %3299, %v264_v50   ;;  %297 = vperm.xlu0 %3298, %v263_v53  }
  0xa7   :  { %v557_v59 = vpack.c.bf16 %v532_v55, %v531_v56  ;;  %v565_v60 = vpack.c.bf16 %v548_v57, %v547_v54  ;;  %v3611_v5 = vpop.permute.xlu2 %195 }
  0xa8   :  { %v126_v61 = vpop.permute.xlu1 %125  ;;  %v121_v63 = vpop.permute.xlu0 %120  ;;  %v256_v56 = vmul.f32 %v3550_v62, %v3611_v5 }
  0xa9   :  { %v242_v0 = vmul.f32 %v3550_v62, %v126_v61  ;;  %760 = vmatpush.bf16.msra.mxu0 %v557_v59  ;;  %849 = vmatpush.bf16.msra.mxu1 %v565_v60  ;;  %v241_v6 = vmul.f32 %v3550_v62, %v121_v63 }
  0xab   :  { %v466_v4 = vadd.f32 %v353_v32, %v242_v0  ;;  %v979_v0 = vld [vmem:[%s4609_s4 + $0x28] sm:$0xf] }
  0xad   :  { %1012 = vperm.xlu2 %3300, %v970_v1   ;;  %v498_v9 = vmul.f32 0.01, %v466_v4 }
  0xae   :  { %1003 = vperm.xlu1 %3299, %v969_v2   ;;  %382 = vperm.xlu0 %3298, %v280_v3   ;;  %v998_v2 = vld [vmem:[%s4609_s4 + $0x74] sm:$0xf]  ;;  %v997_v3 = vld [vmem:[%s4609_s4 + $0x70] sm:$0xf] }
  0xaf   :  { %v530_v17 = vmax.f32 %v466_v4, %v498_v9  ;;  %v418_v19 = vpop.permute.xlu2 %417 }
  0xb0   :  { %v348_v7 = vpop.permute.xlu1 %347  ;;  %v206_v8 = vpop.permute.xlu0 %205 }
  0xb1   :  { %v465_v10 = vadd.f32 %v348_v7, %v241_v6  ;;  %v258_v20 = vmul.f32 %v3550_v62, %v206_v8 }
  0xb3   :  { %v497_v12 = vmul.f32 0.01, %v465_v10 }
  0xb5   :  { %v529_v15 = vmax.f32 %v465_v10, %v497_v12  ;;  %1039 = vperm.xlu2 %3300, %v973_v11   ;;  %v996_v12 = vld [vmem:[%s4609_s4 + $0x6c] sm:$0xf] }
  0xb6   :  { %1030 = vperm.xlu1 %3299, %v972_v13   ;;  %1021 = vperm.xlu0 %3298, %v971_v14   ;;  %v995_v13 = vld [vmem:[%s4609_s4 + $0x68] sm:$0xf]  ;;  %v980_v14 = vld [vmem:[%s4609_s4 + $0x2c] sm:$0xf] }
  0xb7   :  { %v556_v21 = vpack.c.bf16 %v530_v17, %v529_v15  ;;  %v106_v35 = vpop.permute.xlu2 %105 }
  0xb8   :  { %v433_v22 = vpop.permute.xlu1 %432  ;;  %v428_v23 = vpop.permute.xlu0 %427 }
  0xb9   :  { %v482_v24 = vadd.f32 %v433_v22, %v258_v20  ;;  %v481_v25 = vadd.f32 %v428_v23, %v257_v18  ;;  %761 = vmatpush.bf16.msra.mxu0 %v556_v21  ;;  %v238_v18 = vmul.f32 %v3550_v62, %v106_v35 }
  0xbb   :  { %v514_v28 = vmul.f32 0.01, %v482_v24  ;;  %v513_v29 = vmul.f32 0.01, %v481_v25 }
  0xbd   :  { %v546_v30 = vmax.f32 %v482_v24, %v514_v28  ;;  %v545_v31 = vmax.f32 %v481_v25, %v513_v29  ;;  %1066 = vperm.xlu2 %3300, %v976_v27   ;;  %v978_v27 = vld [vmem:[%s4609_s4 + $0x24] sm:$0xf]  ;;  %v993_v28 = vld [vmem:[%s4609_s4 + $0x60] sm:$0xf] }
  0xbe   :  { %1057 = vperm.xlu1 %3299, %v975_v26   ;;  %1048 = vperm.xlu0 %3298, %v974_v16  }
  0xbf   :  { %v564_v32 = vpack.c.bf16 %v546_v30, %v545_v31  ;;  %v328_v48 = vpop.permute.xlu2 %327  ;;  %v977_v30 = vld [vmem:[%s4609_s4 + $0x20] sm:$0xf] }
  0xc0   :  { %v191_v33 = vpop.permute.xlu1 %190  ;;  %v116_v34 = vpop.permute.xlu0 %115 }
  0xc1   :  { %850 = vmatpush.bf16.msra.mxu1 %v564_v32  ;;  %v240_v40 = vmul.f32 %v3550_v62, %v116_v34  ;;  %v255_v43 = vmul.f32 %v3550_v62, %v191_v33 }
  0xc3   :  { %v479_v53 = vadd.f32 %v418_v19, %v255_v43  ;;  %v994_v43 = vld [vmem:[%s4609_s4 + $0x64] sm:$0xf] }
  0xc5   :  { %1273 = vperm.xlu2 %3300, %v999_v36   ;;  %v511_v61 = vmul.f32 0.01, %v479_v53 }
  0xc6   :  { %1138 = vperm.xlu1 %3299, %v984_v37   ;;  %1129 = vperm.xlu0 %3298, %v983_v38  }
  0xc7   :  { %v413_v4 = vpop.permute.xlu2 %412  ;;  %v543_v6 = vmax.f32 %v479_v53, %v511_v61 }
  0xc8   :  { %v343_v41 = vpop.permute.xlu1 %342  ;;  %v338_v42 = vpop.permute.xlu0 %337 }
  0xc9   :  { %v464_v44 = vadd.f32 %v343_v41, %v240_v40  ;;  %v463_v45 = vadd.f32 %v338_v42, %v239_v39  ;;  %v992_v41 = vld [vmem:[%s4609_s4 + $0x5c] sm:$0xf]  ;;  %v991_v42 = vld [vmem:[%s4609_s4 + $0x58] sm:$0xf] }
  0xcb   :  { %v496_v51 = vmul.f32 0.01, %v464_v44  ;;  %v495_v50 = vmul.f32 0.01, %v463_v45 }
  0xcd   :  { %v528_v54 = vmax.f32 %v464_v44, %v496_v51  ;;  %v527_v55 = vmax.f32 %v463_v45, %v495_v50  ;;  %1120 = vperm.xlu2 %3300, %v982_v47   ;;  %v987_v50 = vld [vmem:[%s4609_s4 + $0x48] sm:$0xf] }
  0xce   :  { %1111 = vperm.xlu1 %3299, %v981_v46   ;;  %1282 = vperm.xlu0 %3298, %v1000_v49  }
  0xcf   :  { %v555_v57 = vpack.c.bf16 %v528_v54, %v527_v55  ;;  %v171_v19 = vpop.permute.xlu2 %170  ;;  %v990_v54 = vld [vmem:[%s4609_s4 + $0x54] sm:$0xf]  ;;  %v989_v55 = vld [vmem:[%s4609_s4 + $0x50] sm:$0xf] }
  0xd0   :  { %v101_v59 = vpop.permute.xlu1 %100  ;;  %v423_v60 = vpop.permute.xlu0 %422 }
  0xd1   :  { %v480_v63 = vadd.f32 %v423_v60, %v256_v56  ;;  %762 = vmatpush.bf16.msra.mxu0 %v555_v57  ;;  %v237_v10 = vmul.f32 %v3550_v62, %v101_v59  ;;  %v251_v59 = vmul.f32 %v3550_v62, %v171_v19 }
  0xd3   :  { %v512_v1 = vmul.f32 0.01, %v480_v63  ;;  %v461_v15 = vadd.f32 %v328_v48, %v237_v10 }
  0xd5   :  { %v544_v5 = vmax.f32 %v480_v63, %v512_v1  ;;  %1093 = vperm.xlu2 %3300, %v979_v0   ;;  %v493_v23 = vmul.f32 0.01, %v461_v15 }
  0xd6   :  { %1264 = vperm.xlu1 %3299, %v998_v2   ;;  %1255 = vperm.xlu0 %3298, %v997_v3   ;;  %v985_v3 = vld [vmem:[%s4609_s4 + $0x40] sm:$0xf] }
  0xd7   :  { %v563_v7 = vpack.c.bf16 %v544_v5, %v543_v6  ;;  %v525_v33 = vmax.f32 %v461_v15, %v493_v23  ;;  %v323_v39 = vpop.permute.xlu2 %322  ;;  %v1996_v15 = vld [vmem:[%s4611_s6 + $0x4] sm:$0xf] }
  0xd8   :  { %v186_v8 = vpop.permute.xlu1 %185  ;;  %v181_v9 = vpop.permute.xlu0 %180 }
  0xd9   :  { %v254_v11 = vmul.f32 %v3550_v62, %v186_v8  ;;  %851 = vmatpush.bf16.msra.mxu1 %v563_v7  ;;  %v253_v20 = vmul.f32 %v3550_v62, %v181_v9  ;;  %v988_v7 = vld [vmem:[%s4609_s4 + $0x4c] sm:$0xf] }
  0xdb   :  { %v478_v17 = vadd.f32 %v413_v4, %v254_v11  ;;  %v986_v4 = vld [vmem:[%s4609_s4 + $0x44] sm:$0xf] }
  0xdd   :  { %1246 = vperm.xlu2 %3300, %v996_v12   ;;  %v510_v24 = vmul.f32 0.01, %v478_v17 }
  0xde   :  { %1237 = vperm.xlu1 %3299, %v995_v13   ;;  %1102 = vperm.xlu0 %3298, %v980_v14   ;;  %v1997_v14 = vld [vmem:[%s4611_s6 + $0x8] sm:$0xf] }
  0xdf   :  { %v542_v34 = vmax.f32 %v478_v17, %v510_v24  ;;  %v81_v49 = vpop.permute.xlu2 %80  ;;  %v1995_v17 = vld [vmem:[%s4611_s6] sm:$0xf] }
  0xe0   :  { %v408_v21 = vpop.permute.xlu1 %407  ;;  %v333_v22 = vpop.permute.xlu0 %332 }
  0xe1   :  { %v477_v25 = vadd.f32 %v408_v21, %v253_v20  ;;  %v462_v26 = vadd.f32 %v333_v22, %v238_v18  ;;  %v233_v18 = vmul.f32 %v3550_v62, %v81_v49 }
  0xe3   :  { %v509_v29 = vmul.f32 0.01, %v477_v25  ;;  %v494_v16 = vmul.f32 0.01, %v462_v26 }
  0xe5   :  { %v541_v31 = vmax.f32 %v477_v25, %v509_v29  ;;  %v526_v32 = vmax.f32 %v462_v26, %v494_v16  ;;  %1219 = vperm.xlu2 %3300, %v993_v28   ;;  %v1999_v26 = vld [vmem:[%s4611_s6 + $0x10] sm:$0xf]  ;;  %v1998_v16 = vld [vmem:[%s4611_s6 + $0xc] sm:$0xf] }
  0xe6   :  { %1084 = vperm.xlu1 %3299, %v978_v27   ;;  %1075 = vperm.xlu0 %3298, %v977_v30   ;;  %v2000_v27 = vld [vmem:[%s4611_s6 + $0x14] sm:$0xf] }
  0xe7   :  { %v554_v35 = vpack.c.bf16 %v526_v32, %v525_v33  ;;  %v562_v36 = vpack.c.bf16 %v542_v34, %v541_v31  ;;  %v166_v8 = vpop.permute.xlu2 %165 }
  0xe8   :  { %v96_v37 = vpop.permute.xlu1 %95  ;;  %v91_v38 = vpop.permute.xlu0 %90  ;;  %v250_v33 = vmul.f32 %v3550_v62, %v166_v8  ;;  %v2009_v8 = vld [vmem:[%s4611_s6 + $0x38] sm:$0xf] }
  0xe9   :  { %v236_v40 = vmul.f32 %v3550_v62, %v96_v37  ;;  %763 = vmatpush.bf16.msra.mxu0 %v554_v35  ;;  %852 = vmatpush.bf16.msra.mxu1 %v562_v36  ;;  %v235_v45 = vmul.f32 %v3550_v62, %v91_v38 }
  0xeb   :  { %v460_v44 = vadd.f32 %v323_v39, %v236_v40  ;;  %v2003_v40 = vld [vmem:[%s4611_s6 + $0x20] sm:$0xf] }
  0xed   :  { %1210 = vperm.xlu2 %3300, %v992_v41   ;;  %v492_v48 = vmul.f32 0.01, %v460_v44 }
  0xee   :  { %1201 = vperm.xlu1 %3299, %v991_v42   ;;  %1228 = vperm.xlu0 %3298, %v994_v43   ;;  %v2002_v42 = vld [vmem:[%s4611_s6 + $0x1c] sm:$0xf]  ;;  %v2001_v43 = vld [vmem:[%s4611_s6 + $0x18] sm:$0xf] }
  0xef   :  { %v524_v57 = vmax.f32 %v460_v44, %v492_v48  ;;  %v388_v19 = vpop.permute.xlu2 %387 }
  0xf0   :  { %v318_v46 = vpop.permute.xlu1 %317  ;;  %v176_v47 = vpop.permute.xlu0 %175 }
  0xf1   :  { %v459_v51 = vadd.f32 %v318_v46, %v235_v45  ;;  %v252_v60 = vmul.f32 %v3550_v62, %v176_v47  ;;  %v231_v46 = vmul.f32 %v3550_v62, %v3525_v52  ;;  %v232_v47 = vmul.f32 %v3550_v62, %v3536_v58  ;;  %v2004_v58 = vld [vmem:[%s4611_s6 + $0x24] sm:$0xf] }
  0xf3   :  { %v491_v53 = vmul.f32 0.01, %v459_v51 }
  0xf5   :  { %v523_v56 = vmax.f32 %v459_v51, %v491_v53  ;;  %1165 = vperm.xlu2 %3300, %v987_v50  }
  0xf6   :  { %1192 = vperm.xlu1 %3299, %v990_v54   ;;  %1183 = vperm.xlu0 %3298, %v989_v55   ;;  %v2005_v55 = vld [vmem:[%s4611_s6 + $0x28] sm:$0xf] }
  0xf7   :  { %v553_v61 = vpack.c.bf16 %v524_v57, %v523_v56  ;;  %v156_v39 = vpop.permute.xlu2 %155  ;;  %v2006_v56 = vld [vmem:[%s4611_s6 + $0x2c] sm:$0xf] }
  0xf8   :  { %v403_v63 = vpop.permute.xlu1 %402  ;;  %v398_v0 = vpop.permute.xlu0 %397 }
  0xf9   :  { %v476_v1 = vadd.f32 %v403_v63, %v252_v60  ;;  %v475_v2 = vadd.f32 %v398_v0, %v251_v59  ;;  %764 = vmatpush.bf16.msra.mxu0 %v553_v61  ;;  %v2977_v0 = vld [vmem:[%s4608_s3] sm:$0xf] }
  0xfb   :  { %v508_v5 = vmul.f32 0.01, %v476_v1  ;;  %v507_v6 = vmul.f32 0.01, %v475_v2 }
  0xfd   :  { %v540_v9 = vmax.f32 %v476_v1, %v508_v5  ;;  %v539_v10 = vmax.f32 %v475_v2, %v507_v6  ;;  %1156 = vperm.xlu2 %3300, %v986_v4   ;;  %v3232_v1 = vld [vmem:[%s4608_s3 + $0x4] sm:$0xf0]  ;;  %v248_v2 = vmul.f32 %v3550_v62, %v156_v39  ;;  %v2995_v39 = vld [vmem:[%s4608_s3 + $0x28] sm:$0xf0] }
  0xfe   :  { %1147 = vperm.xlu1 %3299, %v985_v3   ;;  %1174 = vperm.xlu0 %3298, %v988_v7   ;;  %v2978_v5 = vor.u32 %v3232_v1, %v2977_v0  ;;  %v3011_v0 = vld [vmem:[%s4608_s3 + $0x48] sm:$0xf0] }
  0xff   :  { %v561_v11 = vpack.c.bf16 %v540_v9, %v539_v10  ;;  %v378_v59 = vpop.permute.xlu2 %377  ;;  %v2008_v10 = vld [vmem:[%s4611_s6 + $0x34] sm:$0xf] }
 0x100   :  { %v161_v12 = vpop.permute.xlu1 %160  ;;  %v86_v13 = vpop.permute.xlu0 %85 }
 0x101   :  { %853 = vmatpush.bf16.msra.mxu1 %v561_v11  ;;  %v234_v20 = vmul.f32 %v3550_v62, %v86_v13  ;;  %v249_v23 = vmul.f32 %v3550_v62, %v161_v12  ;;  %v2007_v11 = vld [vmem:[%s4611_s6 + $0x30] sm:$0xf]  ;;  %v3231_v13 = vld [vmem:[%s4608_s3 + $0x4] sm:$0xf] }
 0x103   :  { %v473_v30 = vadd.f32 %v388_v19, %v249_v23  ;;  %v2011_v19 = vld [vmem:[%s4611_s6 + $0x40] sm:$0xf] }
 0x105   :  { %2047 = vperm.xlu2 %3300, %v1997_v14   ;;  %v505_v37 = vmul.f32 0.01, %v473_v30  ;;  %v2979_v14 = vld [vmem:[%s4608_s3 + $0x8] sm:$0xf0] }
 0x106   :  { %2038 = vperm.xlu1 %3299, %v1996_v15   ;;  %2029 = vperm.xlu0 %3298, %v1995_v17   ;;  %v2982_v17 = vor.u32 %v3231_v13, %v2979_v14  ;;  %v2682_v13 = vld [vmem:[%s4612_s7 + $0x78] sm:$0xff]  ;;  %v2681_v14 = vld [vmem:[%s4612_s7 + $0x70] sm:$0xff] }
 0x107   :  { %v537_v45 = vmax.f32 %v473_v30, %v505_v37  ;;  %v2017_v30 = vld [vmem:[%s4611_s6 + $0x58] sm:$0xf]  ;;  %v2019_v37 = vld [vmem:[%s4611_s6 + $0x60] sm:$0xf] }
 0x108   :  { %v313_v21 = vpop.permute.xlu1 %312  ;;  %v308_v22 = vpop.permute.xlu0 %307 }
 0x109   :  { %v458_v24 = vadd.f32 %v313_v21, %v234_v20  ;;  %v457_v25 = vadd.f32 %v308_v22, %v233_v18  ;;  %v2012_v18 = vld [vmem:[%s4611_s6 + $0x44] sm:$0xf]  ;;  %v2010_v20 = vld [vmem:[%s4611_s6 + $0x3c] sm:$0xf]  ;;  %v2985_v21 = vld [vmem:[%s4608_s3 + $0x10] sm:$0xf] }
 0x10a   :  { %v3234_v22 = vld [vmem:[%s4608_s3 + $0x14] sm:$0xf0] }
 0x10b   :  { %v490_v28 = vmul.f32 0.01, %v458_v24  ;;  %v489_v29 = vmul.f32 0.01, %v457_v25  ;;  %v2986_v23 = vor.u32 %v3234_v22, %v2985_v21  ;;  %v2684_v21 = vld [vmem:[%s4612_s7 + $0x88] sm:$0xff]  ;;  %v2683_v22 = vld [vmem:[%s4612_s7 + $0x80] sm:$0xff] }
 0x10d   :  { %v522_v31 = vmax.f32 %v458_v24, %v490_v28  ;;  %v521_v32 = vmax.f32 %v457_v25, %v489_v29  ;;  %2074 = vperm.xlu2 %3300, %v2000_v27   ;;  %v2015_v24 = vld [vmem:[%s4611_s6 + $0x50] sm:$0xf]  ;;  %v2014_v25 = vld [vmem:[%s4611_s6 + $0x4c] sm:$0xf]  ;;  %v3233_v27 = vld [vmem:[%s4608_s3 + $0x14] sm:$0xf] }
 0x10e   :  { %2065 = vperm.xlu1 %3299, %v1999_v26   ;;  %2056 = vperm.xlu0 %3298, %v1998_v16   ;;  %v2013_v26 = vld [vmem:[%s4611_s6 + $0x48] sm:$0xf]  ;;  %v2987_v28 = vld [vmem:[%s4608_s3 + $0x18] sm:$0xf0] }
 0x10f   :  { %v552_v34 = vpack.c.bf16 %v522_v31, %v521_v32  ;;  %v2990_v29 = vor.u32 %v3233_v27, %v2987_v28  ;;  %v2018_v16 = vld [vmem:[%s4611_s6 + $0x5c] sm:$0xf]  ;;  %v2016_v31 = vld [vmem:[%s4611_s6 + $0x54] sm:$0xf]  ;;  %v2993_v32 = vld [vmem:[%s4608_s3 + $0x20] sm:$0xf] }
 0x110   :  { %v151_v35 = vpop.permute.xlu1 %150  ;;  %v393_v36 = vpop.permute.xlu0 %392  ;;  %v2687_v27 = vld [vmem:[%s4612_s7 + $0xa0] sm:$0xff]  ;;  %v2686_v28 = vld [vmem:[%s4612_s7 + $0x98] sm:$0xff] }
 0x111   :  { %v474_v38 = vadd.f32 %v393_v36, %v250_v33  ;;  %765 = vmatpush.bf16.msra.mxu0 %v552_v34  ;;  %v247_v49 = vmul.f32 %v3550_v62, %v151_v35  ;;  %v3236_v33 = vld [vmem:[%s4608_s3 + $0x24] sm:$0xf0]  ;;  %v2020_v36 = vld [vmem:[%s4611_s6 + $0x64] sm:$0xf] }
 0x112   :  { %v2994_v34 = vor.u32 %v3236_v33, %v2993_v32  ;;  %v2021_v35 = vld [vmem:[%s4611_s6 + $0x68] sm:$0xf]  ;;  %v2690_v32 = vld [vmem:[%s4612_s7 + $0xb8] sm:$0xff]  ;;  %v2689_v33 = vld [vmem:[%s4612_s7 + $0xb0] sm:$0xff] }
 0x113   :  { %v506_v41 = vmul.f32 0.01, %v474_v38  ;;  %v471_v60 = vadd.f32 %v378_v59, %v247_v49  ;;  %v3003_v49 = vld [vmem:[%s4608_s3 + $0x38] sm:$0xf0]  ;;  %v2673_v59 = vld [vmem:[%s4612_s7 + $0x30] sm:$0xff] }
 0x115   :  { %v538_v44 = vmax.f32 %v474_v38, %v506_v41  ;;  %2101 = vperm.xlu2 %3300, %v2003_v40   ;;  %v503_v6 = vmul.f32 0.01, %v471_v60  ;;  %v3235_v38 = vld [vmem:[%s4608_s3 + $0x24] sm:$0xf]  ;;  %v2024_v41 = vld [vmem:[%s4611_s6 + $0x74] sm:$0xf] }
 0x116   :  { %2092 = vperm.xlu1 %3299, %v2002_v42   ;;  %2083 = vperm.xlu0 %3298, %v2001_v43   ;;  %v2998_v40 = vor.u32 %v3235_v38, %v2995_v39  ;;  %v2023_v42 = vld [vmem:[%s4611_s6 + $0x70] sm:$0xf]  ;;  %v2022_v43 = vld [vmem:[%s4611_s6 + $0x6c] sm:$0xf] }
 0x117   :  { %v560_v48 = vpack.c.bf16 %v538_v44, %v537_v45  ;;  %v535_v12 = vmax.f32 %v471_v60, %v503_v6  ;;  %v3001_v44 = vld [vmem:[%s4608_s3 + $0x30] sm:$0xf]  ;;  %v3238_v45 = vld [vmem:[%s4608_s3 + $0x34] sm:$0xf0]  ;;  %v2672_v60 = vld [vmem:[%s4612_s7 + $0x28] sm:$0xff] }
 0x118   :  { %v303_v51 = vpop.permute.xlu1 %302  ;;  %v298_v50 = vpop.permute.xlu0 %297  ;;  %v3242_v6 = vld [vmem:[%s4608_s3 + $0x54] sm:$0xf0]  ;;  %v2693_v38 = vld [vmem:[%s4612_s7 + $0xd0] sm:$0xff]  ;;  %v2692_v39 = vld [vmem:[%s4612_s7 + $0xc8] sm:$0xff] }
 0x119   :  { %v456_v53 = vadd.f32 %v303_v51, %v232_v47  ;;  %v455_v54 = vadd.f32 %v298_v50, %v231_v46  ;;  %854 = vmatpush.bf16.msra.mxu1 %v560_v48  ;;  %v3002_v46 = vor.u32 %v3238_v45, %v3001_v44  ;;  %v2667_v47 = vld [vmem:[%s4612_s7] sm:$0xff]  ;;  %v2026_v48 = vld [vmem:[%s4611_s6 + $0x7c] sm:$0xf]  ;;  %v2025_v51 = vld [vmem:[%s4611_s6 + $0x78] sm:$0xf] }
 0x11a   :  { %v3237_v50 = vld [vmem:[%s4608_s3 + $0x34] sm:$0xf]  ;;  %v2696_v45 = vld [vmem:[%s4612_s7 + $0xe8] sm:$0xff] }
 0x11b   :  { %v488_v52 = vmul.f32 0.01, %v456_v53  ;;  %v487_v57 = vmul.f32 0.01, %v455_v54  ;;  %v2697_v44 = vld [vmem:[%s4612_s7 + $0xf0] sm:$0xff] }
 0x11d   :  { %v520_v61 = vmax.f32 %v456_v53, %v488_v52  ;;  %v519_v63 = vmax.f32 %v455_v54, %v487_v57  ;;  %2128 = vperm.xlu2 %3300, %v2006_v56   ;;  %v3006_v53 = vor.u32 %v3237_v50, %v3003_v49  ;;  %v2670_v54 = vld [vmem:[%s4612_s7 + $0x18] sm:$0xff]  ;;  %v2668_v56 = vld [vmem:[%s4612_s7 + $0x8] sm:$0xff]  ;;  %v3009_v52 = vld [vmem:[%s4608_s3 + $0x40] sm:$0xf] }
 0x11e   :  { %2119 = vperm.xlu1 %3299, %v2005_v55   ;;  %2110 = vperm.xlu0 %3298, %v2004_v58   ;;  %v2669_v55 = vld [vmem:[%s4612_s7 + $0x10] sm:$0xff]  ;;  %v3240_v57 = vld [vmem:[%s4608_s3 + $0x44] sm:$0xf0]  ;;  %v3043_v50 = vld [vmem:[%s4608_s3 + $0x88] sm:$0xf0] }
 0x11f   :  { %v551_v3 = vpack.c.bf16 %v520_v61, %v519_v63  ;;  %v3010_v58 = vor.u32 %v3240_v57, %v3009_v52  ;;  %v2671_v61 = vld [vmem:[%s4612_s7 + $0x20] sm:$0xff] }
 0x120   :  { %v383_v4 = vpop.permute.xlu0 %382  ;;  %v3239_v63 = vld [vmem:[%s4608_s3 + $0x44] sm:$0xf]  ;;  %v1004_v49 = vpop.permute.xlu1 %1003 }
 0x121   :  { %v472_v7 = vadd.f32 %v383_v4, %v248_v2  ;;  %766 = vmatpush.bf16.msra.mxu0 %v551_v3  ;;  %v3014_v1 = vor.u32 %v3239_v63, %v3011_v0  ;;  %v2676_v2 = vld [vmem:[%s4612_s7 + $0x48] sm:$0xff]  ;;  %v2675_v3 = vld [vmem:[%s4612_s7 + $0x40] sm:$0xff]  ;;  %v2674_v4 = vld [vmem:[%s4612_s7 + $0x38] sm:$0xff] }
 0x122   :  { %v3250_v63 = vld [vmem:[%s4608_s3 + $0x94] sm:$0xf0] }
 0x123   :  { %v504_v9 = vmul.f32 0.01, %v472_v7 }
 0x124   :  { %767 = vmatmul.bf16.vlgmr.msra.gmra.mxu0 %v2978_v5  ;;  %v3017_v5 = vld [vmem:[%s4608_s3 + $0x50] sm:$0xf] }
 0x125   :  { %v536_v62 = vmax.f32 %v472_v7, %v504_v9  ;;  %2155 = vperm.xlu2 %3300, %v2009_v8   ;;  %v3018_v7 = vor.u32 %v3242_v6, %v3017_v5  ;;  %v2679_v8 = vld [vmem:[%s4612_s7 + $0x60] sm:$0xff]  ;;  %v2678_v9 = vld [vmem:[%s4612_s7 + $0x58] sm:$0xff] }
 0x126   :  { %2146 = vperm.xlu1 %3299, %v2008_v10   ;;  %2137 = vperm.xlu0 %3298, %v2007_v11   ;;  %v2677_v10 = vld [vmem:[%s4612_s7 + $0x50] sm:$0xff] }
 0x127   :  { %v559_v15 = vpack.c.bf16 %v536_v62, %v535_v12  ;;  %v3241_v11 = vld [vmem:[%s4608_s3 + $0x54] sm:$0xf]  ;;  %v3019_v62 = vld [vmem:[%s4608_s3 + $0x58] sm:$0xf0] }
 0x128   :  { %v3022_v12 = vor.u32 %v3241_v11, %v3019_v62  ;;  %v3249_v11 = vld [vmem:[%s4608_s3 + $0x94] sm:$0xf]  ;;  %v3051_v62 = vld [vmem:[%s4608_s3 + $0x98] sm:$0xf0] }
 0x129   :  { %855 = vmatpush.bf16.msra.mxu1 %v559_v15  ;;  %v2680_v15 = vld [vmem:[%s4612_s7 + $0x68] sm:$0xff] }
 0x12c   :  { %856 = vmatmul.bf16.vlgmr.msra.gmra.mxu1 %v2982_v17  ;;  %v3025_v17 = vld [vmem:[%s4608_s3 + $0x60] sm:$0xf] }
 0x12d   :  { %2182 = vperm.xlu2 %3300, %v2012_v18   ;;  %v3244_v18 = vld [vmem:[%s4608_s3 + $0x64] sm:$0xf0] }
 0x12e   :  { %2173 = vperm.xlu1 %3299, %v2011_v19   ;;  %2164 = vperm.xlu0 %3298, %v2010_v20   ;;  %v3026_v19 = vor.u32 %v3244_v18, %v3025_v17  ;;  %v2685_v20 = vld [vmem:[%s4612_s7 + $0x90] sm:$0xff]  ;;  %v3054_v18 = vor.u32 %v3249_v11, %v3051_v62 }
 0x134   :  { %772 = vmatmul.bf16.gmra.mxu0 %v2986_v23  ;;  %v3243_v23 = vld [vmem:[%s4608_s3 + $0x64] sm:$0xf] }
 0x135   :  { %2209 = vperm.xlu2 %3300, %v2015_v24   ;;  %v3027_v24 = vld [vmem:[%s4608_s3 + $0x68] sm:$0xf0] }
 0x136   :  { %2200 = vperm.xlu1 %3299, %v2014_v25   ;;  %2191 = vperm.xlu0 %3298, %v2013_v26   ;;  %v3030_v25 = vor.u32 %v3243_v23, %v3027_v24  ;;  %v2688_v26 = vld [vmem:[%s4612_s7 + $0xa8] sm:$0xff] }
 0x13c   :  { %861 = vmatmul.bf16.gmra.mxu1 %v2990_v29  ;;  %v3033_v29 = vld [vmem:[%s4608_s3 + $0x70] sm:$0xf] }
 0x13d   :  { %2236 = vperm.xlu2 %3300, %v2018_v16   ;;  %v3246_v16 = vld [vmem:[%s4608_s3 + $0x74] sm:$0xf0] }
 0x13e   :  { %2227 = vperm.xlu1 %3299, %v2017_v30   ;;  %2218 = vperm.xlu0 %3298, %v2016_v31   ;;  %v3034_v30 = vor.u32 %v3246_v16, %v3033_v29  ;;  %v2691_v31 = vld [vmem:[%s4612_s7 + $0xc0] sm:$0xff] }
 0x144   :  { %777 = vmatmul.bf16.gmra.mxu0 %v2994_v34  ;;  %v3245_v34 = vld [vmem:[%s4608_s3 + $0x74] sm:$0xf] }
 0x145   :  { %2263 = vperm.xlu2 %3300, %v2021_v35   ;;  %v3035_v35 = vld [vmem:[%s4608_s3 + $0x78] sm:$0xf0] }
 0x146   :  { %2254 = vperm.xlu1 %3299, %v2020_v36   ;;  %2245 = vperm.xlu0 %3298, %v2019_v37   ;;  %v3038_v36 = vor.u32 %v3245_v34, %v3035_v35  ;;  %v2694_v37 = vld [vmem:[%s4612_s7 + $0xd8] sm:$0xff] }
 0x14c   :  { %866 = vmatmul.bf16.gmra.mxu1 %v2998_v40  ;;  %v3041_v40 = vld [vmem:[%s4608_s3 + $0x80] sm:$0xf] }
 0x14d   :  { %2290 = vperm.xlu2 %3300, %v2024_v41   ;;  %v3248_v41 = vld [vmem:[%s4608_s3 + $0x84] sm:$0xf0] }
 0x14e   :  { %2281 = vperm.xlu1 %3299, %v2023_v42   ;;  %2272 = vperm.xlu0 %3298, %v2022_v43   ;;  %v3042_v42 = vor.u32 %v3248_v41, %v3041_v40 }
 0x154   :  { %782 = vmatmul.bf16.gmra.mxu0 %v3002_v46  ;;  %v2695_v46 = vld [vmem:[%s4612_s7 + $0xe0] sm:$0xff] }
 0x155   :  { %2701 = vperm.xlu2 %3300, %v2667_v47   ;;  %v3333_v47 = vmov 839922192  }
 0x156   :  { %2308 = vperm.xlu1 %3299, %v2026_v48   ;;  %2299 = vperm.xlu0 %3298, %v2025_v51   ;;  %v1007_v48 = vunpack.c.l.s4 %v3333_v47  ;;  %v3247_v51 = vld [vmem:[%s4608_s3 + $0x84] sm:$0xf] }
 0x15c   :  { %871 = vmatmul.bf16.gmra.mxu1 %v3006_v53  ;;  %v4028_v53 = vunpack.c.0.s8 %v1007_v48 }
 0x15d   :  { %2716 = vperm.xlu2 %3300, %v2670_v54   ;;  %v3046_v54 = vor.u32 %v3247_v51, %v3043_v50 }
 0x15e   :  { %2711 = vperm.xlu1 %3299, %v2669_v55   ;;  %2706 = vperm.xlu0 %3298, %v2668_v56   ;;  %v1009_v52 = vperm.slane %v1004_v49, %v4028_v53 }
 0x160   :  { %v1321_v0 = vunpack.c.l.bf16 %v1009_v52 }
 0x164   :  { %787 = vmatmul.bf16.gmra.mxu0 %v3010_v58  ;;  %v2928_v58 = vld [vmem:[#allocation2] sm:$0x1] }
 0x165   :  { %2731 = vperm.xlu2 %3300, %v2673_v59   ;;  %v2698_v59 = vld [vmem:[%s4612_s7 + $0xf8] sm:$0xff] }
 0x166   :  { %2726 = vperm.xlu1 %3299, %v2672_v60   ;;  %2721 = vperm.xlu0 %3298, %v2671_v61   ;;  %v3049_v61 = vld [vmem:[%s4608_s3 + $0x90] sm:$0xf] }
 0x16c   :  { %876 = vmatmul.bf16.gmra.mxu1 %v3014_v1 }
 0x16d   :  { %2746 = vperm.xlu2 %3300, %v2676_v2   ;;  %v1013_v2 = vpop.permute.xlu2 %1012 }
 0x16e   :  { %2741 = vperm.xlu1 %3299, %v2675_v3   ;;  %2736 = vperm.xlu0 %3298, %v2674_v4   ;;  %v3050_v4 = vor.u32 %v3250_v63, %v3049_v61  ;;  %v3254_v61 = vld [vmem:[%s4608_s3 + $0xb4] sm:$0xf0] }
 0x174   :  { %792 = vmatmul.bf16.gmra.mxu0 %v3018_v7  ;;  %v1018_v7 = vperm.slane %v1013_v2, %v4028_v53 }
 0x175   :  { %2761 = vperm.xlu2 %3300, %v2679_v8   ;;  %v1040_v47 = vpop.permute.xlu2 %1039 }
 0x176   :  { %2756 = vperm.xlu1 %3299, %v2678_v9   ;;  %2751 = vperm.xlu0 %3298, %v2677_v10  }
 0x17c   :  { %881 = vmatmul.bf16.gmra.mxu1 %v3022_v12  ;;  %v1322_v12 = vunpack.c.l.bf16 %v1018_v7 }
 0x17d   :  { %2776 = vperm.xlu2 %3300, %v2682_v13  }
 0x17e   :  { %2771 = vperm.xlu1 %3299, %v2681_v14   ;;  %2766 = vperm.xlu0 %3298, %v2680_v15   ;;  %v1022_v14 = vpop.permute.xlu0 %1021 }
 0x184   :  { %797 = vmatmul.bf16.gmra.mxu0 %v3026_v19 }
 0x185   :  { %2791 = vperm.xlu2 %3300, %v2685_v20  }
 0x186   :  { %2786 = vperm.xlu1 %3299, %v2684_v21   ;;  %2781 = vperm.xlu0 %3298, %v2683_v22   ;;  %v1027_v21 = vperm.slane %v1022_v14, %v4028_v53  ;;  %v1049_v2 = vpop.permute.xlu0 %1048  ;;  %v3067_v14 = vld [vmem:[%s4608_s3 + $0xb8] sm:$0xf0] }
 0x188   :  { %v1323_v29 = vunpack.c.l.bf16 %v1027_v21 }
 0x18c   :  { %886 = vmatmul.bf16.gmra.mxu1 %v3030_v25 }
 0x18d   :  { %2806 = vperm.xlu2 %3300, %v2688_v26  }
 0x18e   :  { %2801 = vperm.xlu1 %3299, %v2687_v27   ;;  %2796 = vperm.xlu0 %3298, %v2686_v28   ;;  %v3057_v27 = vld [vmem:[%s4608_s3 + $0xa0] sm:$0xf]  ;;  %v3252_v28 = vld [vmem:[%s4608_s3 + $0xa4] sm:$0xf0] }
 0x194   :  { %802 = vmatmul.bf16.gmra.mxu0 %v3034_v30 }
 0x195   :  { %2821 = vperm.xlu2 %3300, %v2691_v31   ;;  %v1031_v31 = vpop.permute.xlu1 %1030 }
 0x196   :  { %2816 = vperm.xlu1 %3299, %v2690_v32   ;;  %2811 = vperm.xlu0 %3298, %v2689_v33   ;;  %v3058_v33 = vor.u32 %v3252_v28, %v3057_v27 }
 0x19c   :  { %891 = vmatmul.bf16.gmra.mxu1 %v3038_v36 }
 0x19d   :  { %2836 = vperm.xlu2 %3300, %v2694_v37  }
 0x19e   :  { %2831 = vperm.xlu1 %3299, %v2693_v38   ;;  %2826 = vperm.xlu0 %3298, %v2692_v39   ;;  %v1036_v38 = vperm.slane %v1031_v31, %v4028_v53  ;;  %v1067_v31 = vpop.permute.xlu2 %1066 }
 0x1a1   :  { %v768_v43 = vpop.f32.mrf.mxu0 }
 0x1a4   :  { %807 = vmatmul.bf16.gmra.mxu0 %v3042_v42 }
 0x1a5   :  { %2851 = vperm.xlu2 %3300, %v2697_v44   ;;  %v3059_v44 = vld [vmem:[%s4608_s3 + $0xa8] sm:$0xf0] }
 0x1a6   :  { %2846 = vperm.xlu1 %3299, %v2696_v45   ;;  %2841 = vperm.xlu0 %3298, %v2695_v46   ;;  %v1324_v45 = vunpack.c.l.bf16 %v1036_v38 }
 0x1a9   :  { %v770_v55 = vpop.f32.mrf.mxu0  ;;  %v857_v56 = vpop.f32.mrf.mxu1 }
 0x1aa   :  { %v858_v57 = vadd.f32 %v857_v56, %v768_v43  ;;  %v3251_v43 = vld [vmem:[%s4608_s3 + $0xa4] sm:$0xf] }
 0x1ab   :  { %v3062_v50 = vor.u32 %v3251_v43, %v3059_v44  ;;  %v1072_v43 = vperm.slane %v1067_v31, %v4028_v53 }
 0x1ac   :  { %v937_v60 = vpack.c.bf16 %v858_v57, %v858_v57  ;;  %896 = vmatmul.bf16.gmra.mxu1 %v3046_v54 }
 0x1ae   :  { %v1289_v1 = vunpack.c.l.bf16 %v937_v60  ;;  %2931 = vperm.xlu1 %3299, %v2928_v58   ;;  %2856 = vperm.xlu0 %3298, %v2698_v59   ;;  %v3065_v60 = vld [vmem:[%s4608_s3 + $0xb0] sm:$0xf] }
 0x1b0   :  { %v1353_v3 = vadd.f32 %v1321_v0, %v1289_v1 }
 0x1b1   :  { %v773_v5 = vpop.f32.mrf.mxu0  ;;  %v859_v6 = vpop.f32.mrf.mxu1 }
 0x1b2   :  { %v860_v8 = vadd.f32 %v859_v6, %v770_v55  ;;  %v1385_v9 = vpack.c.bf16 %v1353_v3, %v1353_v3  ;;  %v1045_v55 = vperm.slane %v1040_v47, %v4028_v53 }
 0x1b4   :  { %v938_v10 = vpack.c.bf16 %v860_v8, %v860_v8  ;;  %812 = vmatmul.bf16.gmra.mxu0 %v3050_v4  ;;  %v1417_v15 = vunpack.c.l.bf16 %v1385_v9  ;;  %v1325_v63 = vunpack.c.l.bf16 %v1045_v55  ;;  %v3066_v4 = vor.u32 %v3254_v61, %v3065_v60 }
 0x1b5   :  { %v1054_v9 = vperm.slane %v1049_v2, %v4028_v53  ;;  %v3258_v2 = vld [vmem:[%s4608_s3 + $0xd4] sm:$0xf0] }
 0x1b6   :  { %v1290_v13 = vunpack.c.l.bf16 %v938_v10  ;;  %v1449_v26 = vmul.f32 0.010009766, %v1417_v15 }
 0x1b8   :  { %v1354_v17 = vadd.f32 %v1322_v12, %v1290_v13  ;;  %v1545_v34 = vmax.f32 %v1417_v15, %v1449_v26  ;;  %v3253_v13 = vld [vmem:[%s4608_s3 + $0xb4] sm:$0xf]  ;;  %v1058_v15 = vpop.permute.xlu1 %1057 }
 0x1b9   :  { %v775_v19 = vpop.f32.mrf.mxu0  ;;  %v862_v20 = vpop.f32.mrf.mxu1  ;;  %v3070_v21 = vor.u32 %v3253_v13, %v3067_v14  ;;  %v3083_v13 = vld [vmem:[%s4608_s3 + $0xd8] sm:$0xf0] }
 0x1ba   :  { %v1386_v22 = vpack.c.bf16 %v1354_v17, %v1354_v17  ;;  %v863_v23 = vadd.f32 %v862_v20, %v773_v5  ;;  %v1326_v17 = vunpack.c.l.bf16 %v1054_v9  ;;  %v1130_v14 = vpop.permute.xlu0 %1129 }
 0x1bc   :  { %v939_v24 = vpack.c.bf16 %v863_v23, %v863_v23  ;;  %901 = vmatmul.bf16.gmra.mxu1 %v3054_v18  ;;  %v1418_v25 = vunpack.c.l.bf16 %v1386_v22 }
 0x1be   :  { %v1291_v16 = vunpack.c.l.bf16 %v939_v24  ;;  %v1450_v30 = vmul.f32 0.010009766, %v1418_v25  ;;  %v1063_v24 = vperm.slane %v1058_v15, %v4028_v53 }
 0x1c0   :  { %v1355_v32 = vadd.f32 %v1323_v29, %v1291_v16  ;;  %v1546_v35 = vmax.f32 %v1418_v25, %v1450_v30  ;;  %v3073_v16 = vld [vmem:[%s4608_s3 + $0xc0] sm:$0xf]  ;;  %v3256_v30 = vld [vmem:[%s4608_s3 + $0xc4] sm:$0xf0] }
 0x1c1   :  { %v778_v36 = vpop.f32.mrf.mxu0  ;;  %v864_v37 = vpop.f32.mrf.mxu1 }
 0x1c2   :  { %v865_v39 = vadd.f32 %v864_v37, %v775_v19  ;;  %v4055_v40 = vpack.c.bf16 %v1546_v35, %v1545_v34  ;;  %v1387_v41 = vpack.c.bf16 %v1355_v32, %v1355_v32  ;;  %v1327_v32 = vunpack.c.l.bf16 %v1063_v24  ;;  %v4086_v35 = vpop.permute.xlu1 %1138 }
 0x1c3   :  { %v3074_v37 = vor.u32 %v3256_v30, %v3073_v16 }
 0x1c4   :  { %v940_v42 = vpack.c.bf16 %v865_v39, %v865_v39  ;;  %817 = vmatmul.bf16.gmra.mxu0 %v3058_v33  ;;  %v1419_v48 = vunpack.c.l.bf16 %v1387_v41 }
 0x1c6   :  { %v1292_v46 = vunpack.c.l.bf16 %v940_v42  ;;  %v1451_v59 = vmul.f32 0.010009766, %v1419_v48 }
 0x1c8   :  { %v1356_v51 = vadd.f32 %v1324_v45, %v1292_v46  ;;  %v1547_v5 = vmax.f32 %v1419_v48, %v1451_v59  ;;  %v3255_v48 = vld [vmem:[%s4608_s3 + $0xc4] sm:$0xf] }
 0x1c9   :  { %v780_v49 = vpop.f32.mrf.mxu0  ;;  %v867_v54 = vpop.f32.mrf.mxu1 }
 0x1ca   :  { %v1388_v56 = vpack.c.bf16 %v1356_v51, %v1356_v51  ;;  %v868_v52 = vadd.f32 %v867_v54, %v778_v36  ;;  %v3075_v51 = vld [vmem:[%s4608_s3 + $0xc8] sm:$0xf0]  ;;  %v4097_v54 = vpop.permute.xlu2 %1273  ;;  %v4101_v59 = vpop.permute.xlu1 %1111 }
 0x1cc   :  { %v941_v57 = vpack.c.bf16 %v868_v52, %v868_v52  ;;  %906 = vmatmul.bf16.gmra.mxu1 %v3062_v50  ;;  %v1420_v58 = vunpack.c.l.bf16 %v1388_v56  ;;  %v1328_v50 = vunpack.c.l.bf16 %v1072_v43  ;;  %v3078_v52 = vor.u32 %v3255_v48, %v3075_v51  ;;  %v3261_v43 = vld [vmem:[%s4608_s3 + $0xf4] sm:$0xf] }
 0x1ce   :  { %v1293_v0 = vunpack.c.l.bf16 %v941_v57  ;;  %v1452_v1 = vmul.f32 0.010009766, %v1420_v58 }
 0x1d0   :  { %v1357_v3 = vadd.f32 %v1325_v63, %v1293_v0  ;;  %v1548_v6 = vmax.f32 %v1420_v58, %v1452_v1  ;;  %v3081_v1 = vld [vmem:[%s4608_s3 + $0xd0] sm:$0xf] }
 0x1d1   :  { %v783_v7 = vpop.f32.mrf.mxu0  ;;  %v869_v8 = vpop.f32.mrf.mxu1 }
 0x1d2   :  { %v870_v10 = vadd.f32 %v869_v8, %v780_v49  ;;  %v4071_v11 = vpack.c.bf16 %v1548_v6, %v1547_v5  ;;  %v1389_v62 = vpack.c.bf16 %v1357_v3, %v1357_v3  ;;  %v4111_v9 = vpop.permute.xlu2 %1120 }
 0x1d4   :  { %v942_v12 = vpack.c.bf16 %v870_v10, %v870_v10  ;;  %822 = vmatmul.bf16.gmra.mxu0 %v3066_v4  ;;  %v1421_v19 = vunpack.c.l.bf16 %v1389_v62  ;;  %v3082_v4 = vor.u32 %v3258_v2, %v3081_v1  ;;  %v4115_v62 = vpop.permute.xlu1 %1264 }
 0x1d6   :  { %v1294_v18 = vunpack.c.l.bf16 %v942_v12  ;;  %v1453_v29 = vmul.f32 0.010009766, %v1421_v19  ;;  %v3257_v12 = vld [vmem:[%s4608_s3 + $0xd4] sm:$0xf] }
 0x1d7   :  { %v3086_v15 = vor.u32 %v3257_v12, %v3083_v13 }
 0x1d8   :  { %v1358_v20 = vadd.f32 %v1326_v17, %v1294_v18  ;;  %v1549_v38 = vmax.f32 %v1421_v19, %v1453_v29 }
 0x1d9   :  { %v785_v22 = vpop.f32.mrf.mxu0  ;;  %v872_v23 = vpop.f32.mrf.mxu1 }
 0x1da   :  { %v1390_v25 = vpack.c.bf16 %v1358_v20, %v1358_v20  ;;  %v873_v26 = vadd.f32 %v872_v23, %v783_v7  ;;  %v4123_v19 = vpop.permute.xlu2 %1093  ;;  %v3089_v20 = vld [vmem:[%s4608_s3 + $0xe0] sm:$0xf] }
 0x1dc   :  { %v943_v27 = vpack.c.bf16 %v873_v26, %v873_v26  ;;  %911 = vmatmul.bf16.gmra.mxu1 %v3070_v21  ;;  %v1422_v28 = vunpack.c.l.bf16 %v1390_v25  ;;  %v3260_v21 = vld [vmem:[%s4608_s3 + $0xe4] sm:$0xf0]  ;;  %v4133_v26 = vpop.permute.xlu0 %1282 }
 0x1dd   :  { %v3090_v23 = vor.u32 %v3260_v21, %v3089_v20  ;;  %v1099_v21 = vperm.slane %v4123_v19, %v4028_v53 }
 0x1de   :  { %v1295_v33 = vunpack.c.l.bf16 %v943_v27  ;;  %v1454_v34 = vmul.f32 0.010009766, %v1422_v28  ;;  %v3259_v27 = vld [vmem:[%s4608_s3 + $0xe4] sm:$0xf] }
 0x1e0   :  { %v1359_v36 = vadd.f32 %v1327_v32, %v1295_v33  ;;  %v1550_v39 = vmax.f32 %v1422_v28, %v1454_v34  ;;  %v3091_v28 = vld [vmem:[%s4608_s3 + $0xe8] sm:$0xf0]  ;;  %v3097_v34 = vld [vmem:[%s4608_s3 + $0xf0] sm:$0xf] }
 0x1e1   :  { %v788_v41 = vpop.f32.mrf.mxu0  ;;  %v874_v42 = vpop.f32.mrf.mxu1  ;;  %v3094_v30 = vor.u32 %v3259_v27, %v3091_v28 }
 0x1e2   :  { %v875_v44 = vadd.f32 %v874_v42, %v785_v22  ;;  %v4089_v45 = vpack.c.bf16 %v1550_v39, %v1549_v38  ;;  %v1391_v46 = vpack.c.bf16 %v1359_v36, %v1359_v36  ;;  %v4131_v22 = vpop.permute.xlu1 %1237  ;;  %v4141_v29 = vpop.permute.xlu2 %1246  ;;  %v3262_v36 = vld [vmem:[%s4608_s3 + $0xf4] sm:$0xf0] }
 0x1e3   :  { %v3098_v38 = vor.u32 %v3262_v36, %v3097_v34 }
 0x1e4   :  { %v944_v47 = vpack.c.bf16 %v875_v44, %v875_v44  ;;  %827 = vmatmul.bf16.gmra.mxu0 %v3074_v37  ;;  %v1423_v55 = vunpack.c.l.bf16 %v1391_v46  ;;  %v4145_v33 = vpop.permute.xlu0 %1255  ;;  %v3099_v44 = vld [vmem:[%s4608_s3 + $0xf8] sm:$0xf0] }
 0x1e5   :  { %v3102_v51 = vor.u32 %v3261_v43, %v3099_v44 }
 0x1e6   :  { %v1296_v49 = vunpack.c.l.bf16 %v944_v47  ;;  %v1455_v0 = vmul.f32 0.010009766, %v1423_v55 }
 0x1e8   :  { %v1360_v56 = vadd.f32 %v1328_v50, %v1296_v49  ;;  %v1551_v5 = vmax.f32 %v1423_v55, %v1455_v0  ;;  %v1135_v50 = vperm.slane %v1130_v14, %v4028_v53  ;;  %v1126_v0 = vperm.slane %v4111_v9, %v4028_v53 }
 0x1e9   :  { %v4099_v57 = vpop.f32.mrf.mxu0  ;;  %v877_v58 = vpop.f32.mrf.mxu1 }
 0x1ea   :  { %v1392_v60 = vpack.c.bf16 %v1360_v56, %v1360_v56  ;;  %v4103_v61 = vadd.f32 %v877_v58, %v788_v41  ;;  %v4143_v16 = vpop.permute.xlu1 %1084  ;;  %v4153_v37 = vpop.permute.xlu2 %1219 }
 0x1ec   :  { %916 = vmatmul.bf16.gmra.mxu1 %v3078_v52  ;;  %v1424_v63 = vunpack.c.l.bf16 %v1392_v60  ;;  %v1103_v46 = vpop.permute.xlu0 %1102 }
 0x1ee   :  { %v1456_v3 = vmul.f32 0.010009766, %v1424_v63 }
 0x1f0   :  { %v1552_v6 = vmax.f32 %v1424_v63, %v1456_v3 }
 0x1f1   :  { %v793_v7 = vpop.f32.mrf.mxu0  ;;  %v879_v8 = vpop.f32.mrf.mxu1 }
 0x1f2   :  { %v4113_v10 = vpack.c.bf16 %v1552_v6, %v1551_v5  ;;  %v4155_v42 = vpop.permute.xlu1 %1201  ;;  %v4164_v56 = vpop.permute.xlu2 %1210  ;;  %v880_v5 = vadd.f32 %v879_v8, %v4099_v57  ;;  %v1117_v6 = vperm.slane %v4101_v59, %v4028_v53 }
 0x1f4   :  { %832 = vmatmul.bf16.gmra.mxu0 %v3082_v4  ;;  %v1335_v4 = vunpack.c.l.bf16 %v1135_v50  ;;  %v946_v57 = vpack.c.bf16 %v880_v5, %v880_v5  ;;  %v1333_v59 = vunpack.c.l.bf16 %v1117_v6 }
 0x1f6   :  { %v1298_v43 = vunpack.c.l.bf16 %v946_v57 }
 0x1f9   :  { %v795_v17 = vpop.f32.mrf.mxu0  ;;  %v882_v18 = vpop.f32.mrf.mxu1 }
 0x1fa   :  { %v883_v63 = vadd.f32 %v882_v18, %v793_v7  ;;  %v4168_v1 = vpop.permute.xlu1 %1192  ;;  %v1108_v7 = vperm.slane %v1103_v46, %v4028_v53  ;;  %v1076_v18 = vpop.permute.xlu0 %1075 }
 0x1fb   :  { %v4182_v34 = vpop.permute.xlu2 %1165 }
 0x1fc   :  { %921 = vmatmul.bf16.gmra.mxu1 %v3086_v15  ;;  %v947_v15 = vpack.c.bf16 %v883_v63, %v883_v63  ;;  %v1332_v19 = vunpack.c.l.bf16 %v1108_v7 }
 0x201   :  { %v798_v24 = vpop.f32.mrf.mxu0  ;;  %v884_v25 = vpop.f32.mrf.mxu1 }
 0x202   :  { %v885_v52 = vadd.f32 %v884_v25, %v795_v17  ;;  %v1334_v17 = vunpack.c.l.bf16 %v1126_v0  ;;  %v1148_v46 = vpop.permute.xlu1 %1147 }
 0x204   :  { %837 = vmatmul.bf16.gmra.mxu0 %v3090_v23  ;;  %v948_v12 = vpack.c.bf16 %v885_v52, %v885_v52  ;;  %v1144_v23 = vperm.slane %v4086_v35, %v4028_v53 }
 0x206   :  { %v1300_v25 = vunpack.c.l.bf16 %v948_v12  ;;  %v1336_v44 = vunpack.c.l.bf16 %v1144_v23  ;;  %v4186_v12 = vpop.permute.xlu0 %1228 }
 0x209   :  { %v800_v31 = vpop.f32.mrf.mxu0  ;;  %v887_v32 = vpop.f32.mrf.mxu1 }
 0x20a   :  { %v888_v48 = vadd.f32 %v887_v32, %v798_v24  ;;  %v1299_v32 = vunpack.c.l.bf16 %v947_v15 }
 0x20c   :  { %926 = vmatmul.bf16.gmra.mxu1 %v3094_v30  ;;  %v949_v2 = vpack.c.bf16 %v888_v48, %v888_v48  ;;  %v1090_v30 = vperm.slane %v4143_v16, %v4028_v53 }
 0x20e   :  { %v1301_v9 = vunpack.c.l.bf16 %v949_v2  ;;  %v1330_v16 = vunpack.c.l.bf16 %v1090_v30 }
 0x210   :  { %v1365_v36 = vadd.f32 %v1333_v59, %v1301_v9  ;;  %v1362_v63 = vadd.f32 %v1330_v16, %v1298_v43 }
 0x211   :  { %v803_v39 = vpop.f32.mrf.mxu0  ;;  %v889_v41 = vpop.f32.mrf.mxu1 }
 0x212   :  { %v890_v47 = vadd.f32 %v889_v41, %v800_v31  ;;  %v945_v31 = vpack.c.bf16 %v4103_v61, %v4103_v61  ;;  %v1081_v41 = vperm.slane %v1076_v18, %v4028_v53  ;;  %v1397_v61 = vpack.c.bf16 %v1365_v36, %v1365_v36 }
 0x214   :  { %842 = vmatmul.bf16.gmra.mxu0 %v3098_v38  ;;  %v950_v58 = vpack.c.bf16 %v890_v47, %v890_v47  ;;  %v1364_v47 = vadd.f32 %v1332_v19, %v1300_v25  ;;  %v1297_v50 = vunpack.c.l.bf16 %v945_v31  ;;  %v1429_v15 = vunpack.c.l.bf16 %v1397_v61 }
 0x216   :  { %v1302_v13 = vunpack.c.l.bf16 %v950_v58  ;;  %v1329_v58 = vunpack.c.l.bf16 %v1081_v41  ;;  %v1461_v31 = vmul.f32 0.010009766, %v1429_v15 }
 0x218   :  { %v1366_v27 = vadd.f32 %v1334_v17, %v1302_v13  ;;  %v1361_v13 = vadd.f32 %v1329_v58, %v1297_v50  ;;  %v1184_v50 = vpop.permute.xlu0 %1183 }
 0x219   :  { %v805_v49 = vpop.f32.mrf.mxu0  ;;  %v892_v55 = vpop.f32.mrf.mxu1 }
 0x21a   :  { %v893_v60 = vadd.f32 %v892_v55, %v803_v39  ;;  %v1331_v39 = vunpack.c.l.bf16 %v1099_v21  ;;  %v1398_v48 = vpack.c.bf16 %v1366_v27, %v1366_v27  ;;  %v1157_v21 = vpop.permute.xlu2 %1156  ;;  %v1393_v25 = vpack.c.bf16 %v1361_v13, %v1361_v13 }
 0x21c   :  { %v951_v3 = vpack.c.bf16 %v893_v60, %v893_v60  ;;  %931 = vmatmul.bf16.gmra.mxu1 %v3102_v51  ;;  %v1153_v60 = vperm.slane %v1148_v46, %v4028_v53 }
 0x21e   :  { %v1303_v14 = vunpack.c.l.bf16 %v951_v3  ;;  %v1396_v3 = vpack.c.bf16 %v1364_v47, %v1364_v47  ;;  %v1337_v9 = vunpack.c.l.bf16 %v1153_v60 }
 0x220   :  { %v1367_v20 = vadd.f32 %v1335_v4, %v1303_v14  ;;  %v1430_v4 = vunpack.c.l.bf16 %v1398_v48  ;;  %v1428_v23 = vunpack.c.l.bf16 %v1396_v3  ;;  %v1557_v48 = vmax.f32 %v1429_v15, %v1461_v31 }
 0x221   :  { %v808_v8 = vpop.f32.mrf.mxu0  ;;  %v894_v24 = vpop.f32.mrf.mxu1 }
 0x222   :  { %v895_v28 = vadd.f32 %v894_v24, %v805_v49  ;;  %v1399_v38 = vpack.c.bf16 %v1367_v20, %v1367_v20  ;;  %v1363_v49 = vadd.f32 %v1331_v39, %v1299_v32  ;;  %v1394_v20 = vpack.c.bf16 %v1362_v63, %v1362_v63 }
 0x223   :  { %v1462_v59 = vmul.f32 0.010009766, %v1430_v4  ;;  %v1162_v32 = vperm.slane %v1157_v21, %v4028_v53  ;;  %v1460_v43 = vmul.f32 0.010009766, %v1428_v23 }
 0x224   :  { %v952_v35 = vpack.c.bf16 %v895_v28, %v895_v28  ;;  %v1431_v52 = vunpack.c.l.bf16 %v1399_v38  ;;  %v1395_v14 = vpack.c.bf16 %v1363_v49, %v1363_v49  ;;  %v1426_v19 = vunpack.c.l.bf16 %v1394_v20 }
 0x225   :  { %v1558_v41 = vmax.f32 %v1430_v4, %v1462_v59  ;;  %v1338_v16 = vunpack.c.l.bf16 %v1162_v32 }
 0x226   :  { %v1304_v51 = vunpack.c.l.bf16 %v952_v35  ;;  %v1463_v18 = vmul.f32 0.010009766, %v1431_v52  ;;  %v1427_v27 = vunpack.c.l.bf16 %v1395_v14 }
 0x227   :  { %v1583_v61 = vpack.c.bf16 %v1558_v41, %v1557_v48 }
 0x228   :  { %v1368_v55 = vadd.f32 %v1336_v44, %v1304_v51  ;;  %v1559_v30 = vmax.f32 %v1431_v52, %v1463_v18  ;;  %v1425_v44 = vunpack.c.l.bf16 %v1393_v25  ;;  %v1459_v51 = vmul.f32 0.010009766, %v1427_v27 }
 0x229   :  { %v810_v0 = vpop.f32.mrf.mxu0  ;;  %v897_v2 = vpop.f32.mrf.mxu1  ;;  %v1458_v52 = vmul.f32 0.010009766, %v1426_v19 }
 0x22a   :  { %v1400_v5 = vpack.c.bf16 %v1368_v55, %v1368_v55  ;;  %v898_v6 = vadd.f32 %v897_v2, %v808_v8  ;;  %v1556_v55 = vmax.f32 %v1428_v23, %v1460_v43  ;;  %v1555_v63 = vmax.f32 %v1427_v27, %v1459_v51 }
 0x22b   :  { %v1171_v2 = vperm.slane %v4182_v34, %v4028_v53  ;;  %v1554_v14 = vmax.f32 %v1426_v19, %v1458_v52  ;;  %v1189_v43 = vperm.slane %v1184_v50, %v4028_v53  ;;  %v1198_v50 = vperm.slane %v4168_v1, %v4028_v53 }
 0x22c   :  { %v953_v17 = vpack.c.bf16 %v898_v6, %v898_v6  ;;  %v1432_v7 = vunpack.c.l.bf16 %v1400_v5  ;;  %v1582_v13 = vpack.c.bf16 %v1556_v55, %v1555_v63 }
 0x22e   :  { %v1305_v57 = vunpack.c.l.bf16 %v953_v17  ;;  %v1464_v24 = vmul.f32 0.010009766, %v1432_v7 }
 0x230   :  { %v1369_v28 = vadd.f32 %v1337_v9, %v1305_v57  ;;  %v1560_v8 = vmax.f32 %v1432_v7, %v1464_v24  ;;  %v1339_v9 = vunpack.c.l.bf16 %v1171_v2  ;;  %v1175_v57 = vpop.permute.xlu0 %1174 }
 0x231   :  { %v813_v36 = vpop.f32.mrf.mxu0  ;;  %v899_v38 = vpop.f32.mrf.mxu1 }
 0x232   :  { %v900_v35 = vadd.f32 %v899_v38, %v810_v0  ;;  %v1584_v39 = vpack.c.bf16 %v1560_v8, %v1559_v30  ;;  %v1401_v46 = vpack.c.bf16 %v1369_v28, %v1369_v28  ;;  %v1457_v0 = vmul.f32 0.010009766, %v1425_v44 }
 0x233   :  { %v1180_v28 = vperm.slane %v1175_v57, %v4028_v53 }
 0x234   :  { %v954_v47 = vpack.c.bf16 %v900_v35, %v900_v35  ;;  %1785 = vmatpush.bf16.msra.mxu2 %v1584_v39  ;;  %v1433_v58 = vunpack.c.l.bf16 %v1401_v46  ;;  %v1553_v7 = vmax.f32 %v1425_v44, %v1457_v0 }
 0x235   :  { %v1340_v19 = vunpack.c.l.bf16 %v1180_v28 }
 0x236   :  { %v1306_v49 = vunpack.c.l.bf16 %v954_v47  ;;  %v1465_v18 = vmul.f32 0.010009766, %v1433_v58  ;;  %v1581_v21 = vpack.c.bf16 %v1554_v14, %v1553_v7 }
 0x238   :  { %v1370_v60 = vadd.f32 %v1338_v16, %v1306_v49  ;;  %1786 = vmatpush.bf16.msra.mxu2 %v1583_v61  ;;  %v1561_v59 = vmax.f32 %v1433_v58, %v1465_v18  ;;  %v1341_v16 = vunpack.c.l.bf16 %v1189_v43 }
 0x239   :  { %v815_v3 = vpop.f32.mrf.mxu0  ;;  %v902_v4 = vpop.f32.mrf.mxu1 }
 0x23a   :  { %v1402_v5 = vpack.c.bf16 %v1370_v60, %v1370_v60  ;;  %v903_v6 = vadd.f32 %v902_v4, %v813_v36 }
 0x23c   :  { %v1434_v15 = vunpack.c.l.bf16 %v1402_v5  ;;  %v955_v17 = vpack.c.bf16 %v903_v6, %v903_v6  ;;  %1787 = vmatpush.bf16.msra.mxu2 %v1582_v13 }
 0x23e   :  { %v1307_v20 = vunpack.c.l.bf16 %v955_v17  ;;  %v1466_v23 = vmul.f32 0.010009766, %v1434_v15 }
 0x240   :  { %v1371_v24 = vadd.f32 %v1339_v9, %v1307_v20  ;;  %1788 = vmatpush.bf16.msra.mxu2 %v1581_v21  ;;  %v1562_v34 = vmax.f32 %v1434_v15, %v1466_v23 }
 0x241   :  { %v818_v25 = vpop.f32.mrf.mxu0  ;;  %v904_v27 = vpop.f32.mrf.mxu1 }
 0x242   :  { %v905_v30 = vadd.f32 %v904_v27, %v815_v3  ;;  %v4192_v8 = vpack.c.bf16 %v1562_v34, %v1561_v59  ;;  %v1403_v31 = vpack.c.bf16 %v1371_v24, %v1371_v24  ;;  %v1216_v34 = vperm.slane %v4164_v56, %v4028_v53 }
 0x244   :  { %v956_v32 = vpack.c.bf16 %v905_v30, %v905_v30  ;;  %1789 = vmatpush.bf16.msra.mxu2 %v4113_v10  ;;  %v1435_v38 = vunpack.c.l.bf16 %v1403_v31  ;;  %v1344_v30 = vunpack.c.l.bf16 %v1216_v34 }
 0x246   :  { %v1308_v36 = vunpack.c.l.bf16 %v956_v32  ;;  %v1467_v51 = vmul.f32 0.010009766, %v1435_v38 }
 0x248   :  { %v1372_v35 = vadd.f32 %v1340_v19, %v1308_v36  ;;  %1790 = vmatpush.bf16.msra.mxu2 %v4089_v45  ;;  %v1563_v55 = vmax.f32 %v1435_v38, %v1467_v51 }
 0x249   :  { %v820_v39 = vpop.f32.mrf.mxu0  ;;  %v907_v41 = vpop.f32.mrf.mxu1 }
 0x24a   :  { %v1404_v44 = vpack.c.bf16 %v1372_v35, %v1372_v35  ;;  %v908_v46 = vadd.f32 %v907_v41, %v818_v25 }
 0x24c   :  { %v1436_v47 = vunpack.c.l.bf16 %v1404_v44  ;;  %v957_v48 = vpack.c.bf16 %v908_v46, %v908_v46  ;;  %1791 = vmatpush.bf16.msra.mxu2 %v4071_v11  ;;  %v1342_v11 = vunpack.c.l.bf16 %v1198_v50 }
 0x24e   :  { %v1309_v49 = vunpack.c.l.bf16 %v957_v48  ;;  %v1468_v10 = vmul.f32 0.010009766, %v1436_v47 }
 0x250   :  { %v1373_v61 = vadd.f32 %v1341_v16, %v1309_v49  ;;  %1792 = vmatpush.bf16.msra.mxu2 %v4055_v40  ;;  %v1564_v52 = vmax.f32 %v1436_v47, %v1468_v10  ;;  %v1207_v40 = vperm.slane %v4155_v42, %v4028_v53 }
 0x251   :  { %v823_v45 = vpop.f32.mrf.mxu0  ;;  %v909_v58 = vpop.f32.mrf.mxu1 }
 0x252   :  { %v910_v60 = vadd.f32 %v909_v58, %v820_v39  ;;  %v4201_v63 = vpack.c.bf16 %v1564_v52, %v1563_v55  ;;  %v1405_v0 = vpack.c.bf16 %v1373_v61, %v1373_v61  ;;  %v1343_v1 = vunpack.c.l.bf16 %v1207_v40 }
 0x253   :  { %v1261_v52 = vperm.slane %v4145_v33, %v4028_v53  ;;  %v1279_v33 = vperm.slane %v4097_v54, %v4028_v53 }
 0x254   :  { %v958_v2 = vpack.c.bf16 %v910_v60, %v910_v60  ;;  %v1437_v4 = vunpack.c.l.bf16 %v1405_v0 }
 0x255   :  { %v1349_v60 = vunpack.c.l.bf16 %v1261_v52 }
 0x256   :  { %v1310_v3 = vunpack.c.l.bf16 %v958_v2  ;;  %v1469_v18 = vmul.f32 0.010009766, %v1437_v4 }
 0x258   :  { %v1374_v5 = vadd.f32 %v1342_v11, %v1310_v3  ;;  %v1565_v23 = vmax.f32 %v1437_v4, %v1469_v18  ;;  %v1270_v3 = vperm.slane %v4115_v62, %v4028_v53  ;;  %v1351_v62 = vunpack.c.l.bf16 %v1279_v33 }
 0x259   :  { %v825_v6 = vpop.f32.mrf.mxu0  ;;  %v912_v13 = vpop.f32.mrf.mxu1 }
 0x25a   :  { %v1406_v14 = vpack.c.bf16 %v1374_v5, %v1374_v5  ;;  %v913_v15 = vadd.f32 %v912_v13, %v823_v45  ;;  %v1350_v13 = vunpack.c.l.bf16 %v1270_v3 }
 0x25c   :  { %v1438_v17 = vunpack.c.l.bf16 %v1406_v14  ;;  %v959_v7 = vpack.c.bf16 %v913_v15, %v913_v15 }
 0x25e   :  { %v1311_v9 = vunpack.c.l.bf16 %v959_v7  ;;  %v1470_v20 = vmul.f32 0.010009766, %v1438_v17 }
 0x260   :  { %v1375_v21 = vadd.f32 %v1343_v1, %v1311_v9  ;;  %v1566_v57 = vmax.f32 %v1438_v17, %v1470_v20 }
 0x261   :  { %v828_v24 = vpop.f32.mrf.mxu0  ;;  %v914_v59 = vpop.f32.mrf.mxu1 }
 0x262   :  { %v915_v25 = vadd.f32 %v914_v59, %v825_v6  ;;  %v4207_v27 = vpack.c.bf16 %v1566_v57, %v1565_v23  ;;  %v1407_v42 = vpack.c.bf16 %v1375_v21, %v1375_v21 }
 0x264   :  { %v960_v28 = vpack.c.bf16 %v915_v25, %v915_v25  ;;  %v1439_v32 = vunpack.c.l.bf16 %v1407_v42  ;;  %v1252_v42 = vperm.slane %v4141_v29, %v4028_v53  ;;  %v1234_v29 = vperm.slane %v4186_v12, %v4028_v53  ;;  %v3105_v12 = vld [vmem:[%s4610_s5] sm:$0xf] }
 0x266   :  { %v1312_v31 = vunpack.c.l.bf16 %v960_v28  ;;  %v1471_v43 = vmul.f32 0.010009766, %v1439_v32  ;;  %v1346_v52 = vunpack.c.l.bf16 %v1234_v29  ;;  %v3272_v29 = vld [vmem:[%s4610_s5 + $0x44] sm:$0xf0] }
 0x268   :  { %v1376_v19 = vadd.f32 %v1344_v30, %v1312_v31  ;;  %v1567_v46 = vmax.f32 %v1439_v32, %v1471_v43  ;;  %v1288_v32 = vperm.slane %v4133_v26, %v4028_v53  ;;  %v1225_v26 = vperm.slane %v4153_v37, %v4028_v53 }
 0x269   :  { %v830_v36 = vpop.f32.mrf.mxu0  ;;  %v917_v38 = vpop.f32.mrf.mxu1 }
 0x26a   :  { %v1408_v35 = vpack.c.bf16 %v1376_v19, %v1376_v19  ;;  %v4209_v39 = vadd.f32 %v917_v38, %v828_v24  ;;  %v1243_v19 = vperm.slane %v4131_v22, %v4028_v53  ;;  %v1352_v22 = vunpack.c.l.bf16 %v1288_v32  ;;  %v3121_v32 = vld [vmem:[%s4610_s5 + $0x20] sm:$0xf] }
 0x26b   :  { %v1345_v37 = vunpack.c.l.bf16 %v1225_v26  ;;  %v3145_v26 = vld [vmem:[%s4610_s5 + $0x50] sm:$0xf] }
 0x26c   :  { %v1440_v41 = vunpack.c.l.bf16 %v1408_v35 }
 0x26e   :  { %v1472_v44 = vmul.f32 0.010009766, %v1440_v41 }
 0x270   :  { %v1568_v47 = vmax.f32 %v1440_v41, %v1472_v44 }
 0x271   :  { %v833_v56 = vpop.f32.mrf.mxu0  ;;  %v919_v48 = vpop.f32.mrf.mxu1 }
 0x272   :  { %v4211_v51 = vpack.c.bf16 %v1568_v47, %v1567_v46  ;;  %v920_v24 = vadd.f32 %v919_v48, %v830_v36  ;;  %v1348_v46 = vunpack.c.l.bf16 %v1252_v42  ;;  %v961_v47 = vpack.c.bf16 %v4209_v39, %v4209_v39  ;;  %v3264_v39 = vld [vmem:[%s4610_s5 + $0x4] sm:$0xf0] }
 0x274   :  { %v962_v41 = vpack.c.bf16 %v920_v24, %v920_v24 }
 0x279   :  { %v835_v16 = vpop.f32.mrf.mxu0  ;;  %v922_v49 = vpop.f32.mrf.mxu1 }
 0x27a   :  { %v923_v20 = vadd.f32 %v922_v49, %v833_v56  ;;  %v1347_v49 = vunpack.c.l.bf16 %v1243_v19  ;;  %v3268_v19 = vld [vmem:[%s4610_s5 + $0x24] sm:$0xf0] }
 0x27c   :  { %v963_v28 = vpack.c.bf16 %v923_v20, %v923_v20 }
 0x27e   :  { %v1315_v56 = vunpack.c.l.bf16 %v963_v28 }
 0x281   :  { %v924_v10 = vpop.f32.mrf.mxu1  ;;  %v838_v61 = vpop.f32.mrf.mxu0 }
 0x282   :  { %v925_v18 = vadd.f32 %v924_v10, %v835_v16  ;;  %v1314_v10 = vunpack.c.l.bf16 %v962_v41 }
 0x284   :  { %v964_v59 = vpack.c.bf16 %v925_v18, %v925_v18 }
 0x286   :  { %v1316_v36 = vunpack.c.l.bf16 %v964_v59 }
 0x289   :  { %v927_v55 = vpop.f32.mrf.mxu1  ;;  %v840_v50 = vpop.f32.mrf.mxu0 }
 0x28a   :  { %v928_v45 = vadd.f32 %v927_v55, %v838_v61  ;;  %v1380_v61 = vadd.f32 %v1348_v46, %v1316_v36  ;;  %v3129_v36 = vld [vmem:[%s4610_s5 + $0x30] sm:$0xf]  ;;  %v3137_v46 = vld [vmem:[%s4610_s5 + $0x40] sm:$0xf] }
 0x28c   :  { %v965_v58 = vpack.c.bf16 %v928_v45, %v928_v45  ;;  %v1313_v45 = vunpack.c.l.bf16 %v961_v47  ;;  %v3138_v47 = vor.u32 %v3272_v29, %v3137_v46 }
 0x28e   :  { %v1317_v0 = vunpack.c.l.bf16 %v965_v58  ;;  %v1379_v58 = vadd.f32 %v1347_v49, %v1315_v56  ;;  %v3267_v56 = vld [vmem:[%s4610_s5 + $0x24] sm:$0xf] }
 0x290   :  { %v1381_v2 = vadd.f32 %v1349_v60, %v1317_v0  ;;  %v3106_v0 = vor.u32 %v3264_v39, %v3105_v12  ;;  %v3271_v12 = vld [vmem:[%s4610_s5 + $0x44] sm:$0xf]  ;;  %v3139_v39 = vld [vmem:[%s4610_s5 + $0x48] sm:$0xf0] }
 0x291   :  { %v929_v11 = vpop.f32.mrf.mxu1  ;;  %v843_v14 = vpop.f32.mrf.mxu0 }
 0x292   :  { %v930_v4 = vadd.f32 %v929_v11, %v840_v50  ;;  %v1413_v5 = vpack.c.bf16 %v1381_v2, %v1381_v2  ;;  %v1378_v2 = vadd.f32 %v1346_v52, %v1314_v10  ;;  %v1412_v11 = vpack.c.bf16 %v1380_v61, %v1380_v61  ;;  %1793 = vmatmul.bf16.vlgmr.msra.gmra.mxu2 %v3106_v0  ;;  %v3269_v10 = vld [vmem:[%s4610_s5 + $0x34] sm:$0xf]  ;;  %v3131_v61 = vld [vmem:[%s4610_s5 + $0x38] sm:$0xf0]  ;;  %v4295_v52 = vpop.permute.xlu0 %2029  ;;  %v4311_v0 = vpop.permute.xlu2 %2047 }
 0x294   :  { %v966_v6 = vpack.c.bf16 %v930_v4, %v930_v4  ;;  %v1445_v15 = vunpack.c.l.bf16 %v1413_v5  ;;  %v1377_v4 = vadd.f32 %v1345_v37, %v1313_v45  ;;  %v1411_v5 = vpack.c.bf16 %v1379_v58, %v1379_v58  ;;  %v3153_v45 = vld [vmem:[%s4610_s5 + $0x60] sm:$0xf]  ;;  %v3276_v58 = vld [vmem:[%s4610_s5 + $0x64] sm:$0xf0] }
 0x296   :  { %v1318_v40 = vunpack.c.l.bf16 %v966_v6  ;;  %v1477_v57 = vmul.f32 0.010009766, %v1445_v15  ;;  %v1443_v33 = vunpack.c.l.bf16 %v1411_v5 }
 0x298   :  { %v1382_v17 = vadd.f32 %v1350_v13, %v1318_v40  ;;  %v1573_v31 = vmax.f32 %v1445_v15, %v1477_v57  ;;  %v1410_v40 = vpack.c.bf16 %v1378_v2, %v1378_v2  ;;  %v3113_v57 = vld [vmem:[%s4610_s5 + $0x10] sm:$0xf]  ;;  %v3142_v2 = vor.u32 %v3271_v12, %v3139_v39 }
 0x299   :  { %v932_v7 = vpop.f32.mrf.mxu1  ;;  %v845_v38 = vpop.f32.mrf.mxu0 }
 0x29a   :  { %v1414_v1 = vpack.c.bf16 %v1382_v17, %v1382_v17  ;;  %v933_v9 = vadd.f32 %v932_v7, %v843_v14  ;;  %v1444_v14 = vunpack.c.l.bf16 %v1412_v11  ;;  %v1409_v17 = vpack.c.bf16 %v1377_v4, %v1377_v4  ;;  %v4313_v37 = vpop.permute.xlu0 %2056  ;;  %v3161_v11 = vld [vmem:[%s4610_s5 + $0x70] sm:$0xf]  ;;  %v4323_v5 = vpop.permute.xlu2 %2074 }
 0x29c   :  { %v1446_v21 = vunpack.c.l.bf16 %v1414_v1  ;;  %v967_v23 = vpack.c.bf16 %v933_v9, %v933_v9  ;;  %v1442_v1 = vunpack.c.l.bf16 %v1410_v40  ;;  %v1476_v20 = vmul.f32 0.010009766, %v1444_v14  ;;  %v3273_v40 = vld [vmem:[%s4610_s5 + $0x54] sm:$0xf] }
 0x29e   :  { %v1319_v34 = vunpack.c.l.bf16 %v967_v23  ;;  %v1478_v25 = vmul.f32 0.010009766, %v1446_v21  ;;  %v1475_v23 = vmul.f32 0.010009766, %v1443_v33  ;;  %v1572_v24 = vmax.f32 %v1444_v14, %v1476_v20  ;;  %v3147_v14 = vld [vmem:[%s4610_s5 + $0x58] sm:$0xf0] }
 0x29f   :  { %v1474_v59 = vmul.f32 0.010009766, %v1442_v1 }
 0x2a0   :  { %v1383_v30 = vadd.f32 %v1351_v62, %v1319_v34  ;;  %v1574_v54 = vmax.f32 %v1446_v21, %v1478_v25  ;;  %v1441_v21 = vunpack.c.l.bf16 %v1409_v17  ;;  %v3266_v62 = vld [vmem:[%s4610_s5 + $0x14] sm:$0xf0]  ;;  %v1571_v25 = vmax.f32 %v1443_v33, %v1475_v23 }
 0x2a1   :  { %v934_v35 = vpop.f32.mrf.mxu1  ;;  %v3114_v34 = vor.u32 %v3266_v62, %v3113_v57  ;;  %v3150_v17 = vor.u32 %v3273_v40, %v3147_v14  ;;  %v3275_v57 = vld [vmem:[%s4610_s5 + $0x64] sm:$0xf]  ;;  %v3155_v62 = vld [vmem:[%s4610_s5 + $0x68] sm:$0xf0] }
 0x2a2   :  { %v935_v43 = vadd.f32 %v934_v35, %v845_v38  ;;  %v1591_v44 = vpack.c.bf16 %v1574_v54, %v1573_v31  ;;  %v1415_v48 = vpack.c.bf16 %v1383_v30, %v1383_v30  ;;  %v1473_v42 = vmul.f32 0.010009766, %v1441_v21  ;;  %v3263_v35 = vld [vmem:[%s4610_s5 + $0x4] sm:$0xf]  ;;  %v4335_v33 = vpop.permute.xlu2 %2101 }
 0x2a3   :  { %v1590_v28 = vpack.c.bf16 %v1572_v24, %v1571_v25  ;;  %v1570_v30 = vmax.f32 %v1442_v1, %v1474_v59  ;;  %1798 = vmatmul.bf16.gmra.mxu2 %v3114_v34  ;;  %v3122_v38 = vor.u32 %v3268_v19, %v3121_v32  ;;  %v3280_v1 = vld [vmem:[%s4610_s5 + $0x84] sm:$0xf0]  ;;  %v3158_v59 = vor.u32 %v3275_v57, %v3155_v62  ;;  %v3277_v32 = vld [vmem:[%s4610_s5 + $0x74] sm:$0xf]  ;;  %v3163_v19 = vld [vmem:[%s4610_s5 + $0x78] sm:$0xf0] }
 0x2a4   :  { %v968_v16 = vpack.c.bf16 %v935_v43, %v935_v43  ;;  %v1447_v60 = vunpack.c.l.bf16 %v1415_v48  ;;  %v1569_v31 = vmax.f32 %v1441_v21, %v1473_v42  ;;  %v3265_v43 = vld [vmem:[%s4610_s5 + $0x14] sm:$0xf]  ;;  %v3123_v48 = vld [vmem:[%s4610_s5 + $0x28] sm:$0xf0] }
 0x2a6   :  { %v1320_v55 = vunpack.c.l.bf16 %v968_v16  ;;  %v1479_v13 = vmul.f32 0.010009766, %v1447_v60  ;;  %v1589_v54 = vpack.c.bf16 %v1570_v30, %v1569_v31  ;;  %v3126_v16 = vor.u32 %v3267_v56, %v3123_v48  ;;  %v3177_v30 = vld [vmem:[%s4610_s5 + $0x90] sm:$0xf]  ;;  %v3282_v31 = vld [vmem:[%s4610_s5 + $0x94] sm:$0xf0] }
 0x2a7   :  { %v3171_v56 = vld [vmem:[%s4610_s5 + $0x88] sm:$0xf0] }
 0x2a8   :  { %v1384_v50 = vadd.f32 %v1352_v22, %v1320_v55  ;;  %v1575_v7 = vmax.f32 %v1447_v60, %v1479_v13  ;;  %v3274_v22 = vld [vmem:[%s4610_s5 + $0x54] sm:$0xf0]  ;;  %v3134_v55 = vor.u32 %v3269_v10, %v3131_v61  ;;  %v4303_v60 = vpop.permute.xlu1 %2038 }
 0x2a9   :  { %v3146_v49 = vor.u32 %v3274_v22, %v3145_v26 }
 0x2aa   :  { %v1416_v3 = vpack.c.bf16 %v1384_v50, %v1384_v50  ;;  %v3154_v50 = vor.u32 %v3276_v58, %v3153_v45  ;;  %v4347_v21 = vpop.permute.xlu2 %2128  ;;  %v3193_v58 = vld [vmem:[%s4610_s5 + $0xb0] sm:$0xf] }
 0x2ac   :  { %v1448_v6 = vunpack.c.l.bf16 %v1416_v3  ;;  %v3278_v3 = vld [vmem:[%s4610_s5 + $0x74] sm:$0xf0] }
 0x2ad   :  { %v3162_v13 = vor.u32 %v3278_v3, %v3161_v11 }
 0x2ae   :  { %v1480_v15 = vmul.f32 0.010009766, %v1448_v6 }
 0x2b0   :  { %v1576_v18 = vmax.f32 %v1448_v6, %v1480_v15  ;;  %v4321_v4 = vpop.permute.xlu1 %2065  ;;  %v4325_v6 = vpop.permute.xlu0 %2083 }
 0x2b2   :  { %v1592_v9 = vpack.c.bf16 %v1576_v18, %v1575_v7  ;;  %v3169_v18 = vld [vmem:[%s4610_s5 + $0x80] sm:$0xf]  ;;  %v4359_v25 = vpop.permute.xlu2 %2155 }
 0x2b3   :  { %1803 = vmatmul.bf16.gmra.mxu2 %v3122_v38 }
 0x2b4   :  { %1874 = vmatpush.bf16.msra.mxu3 %v1592_v9  ;;  %v3170_v9 = vor.u32 %v3280_v1, %v3169_v18 }
 0x2b8   :  { %1875 = vmatpush.bf16.msra.mxu3 %v1591_v44  ;;  %v3115_v44 = vld [vmem:[%s4610_s5 + $0x18] sm:$0xf0]  ;;  %v4333_v15 = vpop.permute.xlu1 %2092  ;;  %v4337_v7 = vpop.permute.xlu0 %2110 }
 0x2bc   :  { %1876 = vmatpush.bf16.msra.mxu3 %v1590_v28 }
 0x2c0   :  { %1877 = vmatpush.bf16.msra.mxu3 %v1589_v54  ;;  %v4345_v20 = vpop.permute.xlu1 %2119  ;;  %v4349_v23 = vpop.permute.xlu0 %2137  ;;  %v3178_v54 = vor.u32 %v3282_v31, %v3177_v30 }
 0x2c4   :  { %1878 = vmatpush.bf16.msra.mxu3 %v4211_v51  ;;  %v3107_v51 = vld [vmem:[%s4610_s5 + $0x8] sm:$0xf0] }
 0x2c5   :  { %v3110_v41 = vor.u32 %v3263_v35, %v3107_v51  ;;  %v4377_v51 = vpop.permute.xlu2 %2182 }
 0x2c8   :  { %1879 = vmatpush.bf16.msra.mxu3 %v4207_v27  ;;  %v4357_v34 = vpop.permute.xlu1 %2146  ;;  %v4361_v42 = vpop.permute.xlu0 %2164 }
 0x2cc   :  { %1880 = vmatpush.bf16.msra.mxu3 %v4201_v63  ;;  %v3270_v63 = vld [vmem:[%s4610_s5 + $0x34] sm:$0xf0] }
 0x2cd   :  { %v3130_v27 = vor.u32 %v3270_v63, %v3129_v36  ;;  %v3166_v36 = vor.u32 %v3277_v32, %v3163_v19 }
 0x2cf   :  { %1808 = vmatmul.bf16.gmra.mxu2 %v3130_v27 }
 0x2d0   :  { %1881 = vmatpush.bf16.msra.mxu3 %v4192_v8  ;;  %v3118_v8 = vor.u32 %v3265_v43, %v3115_v44  ;;  %v4375_v38 = vpop.permute.xlu1 %2173  ;;  %v3185_v43 = vld [vmem:[%s4610_s5 + $0xa0] sm:$0xf]  ;;  %v3284_v44 = vld [vmem:[%s4610_s5 + $0xa4] sm:$0xf0] }
 0x2d1   :  { %v3186_v29 = vor.u32 %v3284_v44, %v3185_v43 }
 0x2d3   :  { %1882 = vmatmul.bf16.vlgmr.msra.gmra.mxu3 %v3110_v41  ;;  %v4379_v41 = vpop.permute.xlu0 %2191 }
 0x2d8   :  { %v4383_v27 = vpop.permute.xlu1 %2200 }
 0x2db   :  { %v4393_v46 = vpop.permute.xlu0 %2218 }
 0x2df   :  { %1813 = vmatmul.bf16.gmra.mxu2 %v3138_v47  ;;  %v3279_v47 = vld [vmem:[%s4610_s5 + $0x84] sm:$0xf] }
 0x2e0   :  { %v4403_v26 = vpop.permute.xlu1 %2227 }
 0x2e3   :  { %1887 = vmatmul.bf16.gmra.mxu3 %v3118_v8  ;;  %v4391_v8 = vpop.permute.xlu2 %2209 }
 0x2e8   :  { %v4419_v11 = vpop.permute.xlu1 %2254 }
 0x2eb   :  { %v4405_v22 = vpop.permute.xlu2 %2236 }
 0x2ef   :  { %1818 = vmatmul.bf16.gmra.mxu2 %v3146_v49  ;;  %v4407_v49 = vpop.permute.xlu0 %2245 }
 0x2f0   :  { %v4435_v19 = vpop.permute.xlu1 %2281 }
 0x2f3   :  { %1892 = vmatmul.bf16.gmra.mxu3 %v3126_v16  ;;  %v3174_v16 = vor.u32 %v3279_v47, %v3171_v56  ;;  %v4427_v40 = vpop.permute.xlu2 %2263 }
 0x2f7   :  { %v4429_v14 = vpop.permute.xlu0 %2272 }
 0x2ff   :  { %1823 = vmatmul.bf16.gmra.mxu2 %v3154_v50  ;;  %v3286_v50 = vld [vmem:[%s4610_s5 + $0xb4] sm:$0xf0] }
 0x300   :  { %v3194_v39 = vor.u32 %v3286_v50, %v3193_v58 }
 0x303   :  { %1897 = vmatmul.bf16.gmra.mxu3 %v3134_v55  ;;  %v2035_v55 = vperm.slane %v4295_v52, %v4028_v53  ;;  %v3281_v52 = vld [vmem:[%s4610_s5 + $0x94] sm:$0xf] }
 0x30f   :  { %1828 = vmatmul.bf16.gmra.mxu2 %v3162_v13  ;;  %v3179_v13 = vld [vmem:[%s4610_s5 + $0x98] sm:$0xf0] }
 0x313   :  { %1902 = vmatmul.bf16.gmra.mxu3 %v3142_v2  ;;  %v2347_v2 = vunpack.c.l.bf16 %v2035_v55  ;;  %v3288_v55 = vld [vmem:[%s4610_s5 + $0xc4] sm:$0xf0] }
 0x315   :  { %v1794_v24 = vpop.f32.mrf.mxu2 }
 0x31d   :  { %v1796_v28 = vpop.f32.mrf.mxu2 }
 0x31f   :  { %1833 = vmatmul.bf16.gmra.mxu2 %v3170_v9  ;;  %v2044_v9 = vperm.slane %v4303_v60, %v4028_v53 }
 0x321   :  { %v2348_v31 = vunpack.c.l.bf16 %v2044_v9 }
 0x323   :  { %1907 = vmatmul.bf16.gmra.mxu3 %v3150_v17 }
 0x326   :  { %v1799_v35 = vpop.f32.mrf.mxu2 }
 0x32e   :  { %v4381_v63 = vpop.f32.mrf.mxu2 }
 0x32f   :  { %1838 = vmatmul.bf16.gmra.mxu2 %v3178_v54 }
 0x333   :  { %1912 = vmatmul.bf16.gmra.mxu3 %v3158_v59 }
 0x336   :  { %v4401_v48 = vpop.f32.mrf.mxu2 }
 0x33e   :  { %v4409_v61 = vpop.f32.mrf.mxu2 }
 0x33f   :  { %1843 = vmatmul.bf16.gmra.mxu2 %v3186_v29  ;;  %v2053_v29 = vperm.slane %v4311_v0, %v4028_v53 }
 0x343   :  { %1917 = vmatmul.bf16.gmra.mxu3 %v3166_v36 }
 0x34f   :  { %1848 = vmatmul.bf16.gmra.mxu2 %v3194_v39 }
 0x352   :  { %v4431_v1 = vpop.f32.mrf.mxu2 }
 0x353   :  { %1922 = vmatmul.bf16.gmra.mxu3 %v3174_v16  ;;  %v4443_v16 = vpop.permute.xlu0 %2299 }
 0x356   :  { %v1883_v10 = vpop.f32.mrf.mxu3 }
 0x357   :  { %v1884_v45 = vadd.f32 %v1883_v10, %v1794_v24  ;;  %v3182_v24 = vor.u32 %v3281_v52, %v3179_v13  ;;  %v3201_v10 = vld [vmem:[%s4610_s5 + $0xc0] sm:$0xf] }
 0x358   :  { %v3202_v50 = vor.u32 %v3288_v55, %v3201_v10 }
 0x359   :  { %v1963_v12 = vpack.c.bf16 %v1884_v45, %v1884_v45 }
 0x35a   :  { %v4437_v44 = vpop.f32.mrf.mxu2 }
 0x35b   :  { %v2315_v3 = vunpack.c.l.bf16 %v1963_v12  ;;  %v2349_v12 = vunpack.c.l.bf16 %v2053_v29 }
 0x35d   :  { %v2379_v17 = vadd.f32 %v2347_v2, %v2315_v3  ;;  %v3187_v3 = vld [vmem:[%s4610_s5 + $0xa8] sm:$0xf0] }
 0x35e   :  { %v1885_v18 = vpop.f32.mrf.mxu3 }
 0x35f   :  { %v2411_v57 = vpack.c.bf16 %v2379_v17, %v2379_v17  ;;  %v1886_v62 = vadd.f32 %v1885_v18, %v1796_v28  ;;  %v4441_v28 = vpop.permute.xlu2 %2290  ;;  %1853 = vmatmul.bf16.gmra.mxu2 %v3202_v50  ;;  %v2062_v17 = vperm.slane %v4313_v37, %v4028_v53 }
 0x361   :  { %v2443_v59 = vunpack.c.l.bf16 %v2411_v57  ;;  %v1964_v30 = vpack.c.bf16 %v1886_v62, %v1886_v62 }
 0x362   :  { %v4459_v57 = vpop.f32.mrf.mxu2 }
 0x363   :  { %v2475_v54 = vmul.f32 0.010009766, %v2443_v59  ;;  %v2316_v32 = vunpack.c.l.bf16 %v1964_v30  ;;  %1927 = vmatmul.bf16.gmra.mxu3 %v3182_v24 }
 0x365   :  { %v2380_v36 = vadd.f32 %v2348_v31, %v2316_v32  ;;  %v2571_v47 = vmax.f32 %v2443_v59, %v2475_v54  ;;  %v4462_v31 = vpop.permute.xlu1 %2308 }
 0x366   :  { %v1888_v43 = vpop.f32.mrf.mxu3 }
 0x367   :  { %v2412_v60 = vpack.c.bf16 %v2380_v36, %v2380_v36  ;;  %v1889_v56 = vadd.f32 %v1888_v43, %v1799_v35  ;;  %v2603_v0 = vpack.c.bf16 %v2571_v47, %v2571_v47  ;;  %v3283_v35 = vld [vmem:[%s4610_s5 + $0xa4] sm:$0xf]  ;;  %v2350_v43 = vunpack.c.l.bf16 %v2062_v17  ;;  %v2702_v29 = vpop.permute.xlu2 %2701  ;;  %v2707_v47 = vpop.permute.xlu0 %2706 }
 0x368   :  { %v3190_v9 = vor.u32 %v3283_v35, %v3187_v3  ;;  %v3209_v35 = vld [vmem:[%s4610_s5 + $0xd0] sm:$0xf]  ;;  %v3290_v3 = vld [vmem:[%s4610_s5 + $0xd4] sm:$0xf0] }
 0x369   :  { %v2444_v45 = vunpack.c.l.bf16 %v2412_v60  ;;  %v1965_v58 = vpack.c.bf16 %v1889_v56, %v1889_v56  ;;  %v2635_v62 = vunpack.c.l.bf16 %v2603_v0 }
 0x36b   :  { %v2476_v39 = vmul.f32 0.010009766, %v2444_v45  ;;  %v2317_v2 = vunpack.c.l.bf16 %v1965_v58  ;;  %v2859_v60 = vmul.f32 %v2702_v29, %v2635_v62 }
 0x36d   :  { %v2572_v52 = vmax.f32 %v2444_v45, %v2476_v39  ;;  %v2381_v13 = vadd.f32 %v2349_v12, %v2317_v2  ;;  %v4464_v12 = vpop.f32.mrf.mxu2 }
 0x36e   :  { %v1890_v18 = vpop.f32.mrf.mxu3 }
 0x36f   :  { %v2604_v24 = vpack.c.bf16 %v2572_v52, %v2572_v52  ;;  %v2413_v59 = vpack.c.bf16 %v2381_v13, %v2381_v13  ;;  %v1891_v30 = vadd.f32 %v1890_v18, %v4381_v63  ;;  %v2071_v63 = vperm.slane %v4321_v4, %v4028_v53 }
 0x370   :  { %v3210_v18 = vor.u32 %v3290_v3, %v3209_v35 }
 0x371   :  { %v2636_v54 = vunpack.c.l.bf16 %v2604_v24  ;;  %v2445_v32 = vunpack.c.l.bf16 %v2413_v59  ;;  %v1966_v36 = vpack.c.bf16 %v1891_v30, %v1891_v30  ;;  %v2351_v62 = vunpack.c.l.bf16 %v2071_v63  ;;  %v3195_v30 = vld [vmem:[%s4610_s5 + $0xb8] sm:$0xf0]  ;;  %v2717_v63 = vpop.permute.xlu2 %2716 }
 0x372   :  { %1858 = vmatmul.bf16.gmra.mxu2 %v3210_v18 }
 0x373   :  { %v2860_v56 = vmul.f32 %v2707_v47, %v2636_v54  ;;  %v2477_v37 = vmul.f32 0.010009766, %v2445_v32  ;;  %v2318_v10 = vunpack.c.l.bf16 %v1966_v36  ;;  %1932 = vmatmul.bf16.gmra.mxu3 %v3190_v9  ;;  %v2712_v9 = vpop.permute.xlu1 %2711 }
 0x375   :  { %v2891_v55 = vadd.f32 %v2860_v56, %v2859_v60  ;;  %v2573_v45 = vmax.f32 %v2445_v32, %v2477_v37  ;;  %v2382_v58 = vadd.f32 %v2350_v43, %v2318_v10  ;;  %v2080_v43 = vperm.slane %v4323_v5, %v4028_v53  ;;  %v4483_v47 = vpop.f32.mrf.mxu2 }
 0x376   :  { %v1893_v50 = vpop.f32.mrf.mxu3 }
 0x377   :  { %v2605_v0 = vpack.c.bf16 %v2573_v45, %v2573_v45  ;;  %v2414_v39 = vpack.c.bf16 %v2382_v58, %v2382_v58  ;;  %v1894_v2 = vadd.f32 %v1893_v50, %v4401_v48  ;;  %v3285_v48 = vld [vmem:[%s4610_s5 + $0xb4] sm:$0xf] }
 0x378   :  { %v3198_v10 = vor.u32 %v3285_v48, %v3195_v30 }
 0x379   :  { %v2637_v52 = vunpack.c.l.bf16 %v2605_v0  ;;  %v2446_v13 = vunpack.c.l.bf16 %v2414_v39  ;;  %v1967_v17 = vpack.c.bf16 %v1894_v2, %v1894_v2  ;;  %v2352_v0 = vunpack.c.l.bf16 %v2080_v43 }
 0x37b   :  { %v2861_v24 = vmul.f32 %v2712_v9, %v2637_v52  ;;  %v2478_v4 = vmul.f32 0.010009766, %v2446_v13  ;;  %v2319_v59 = vunpack.c.l.bf16 %v1967_v17  ;;  %v2089_v17 = vperm.slane %v4325_v6, %v4028_v53 }
 0x37d   :  { %v2892_v54 = vadd.f32 %v2891_v55, %v2861_v24  ;;  %v2574_v32 = vmax.f32 %v2446_v13, %v2478_v4  ;;  %v2383_v36 = vadd.f32 %v2351_v62, %v2319_v59  ;;  %v4486_v13 = vpop.f32.mrf.mxu2  ;;  %v3217_v62 = vld [vmem:[%s4610_s5 + $0xe0] sm:$0xf]  ;;  %v3292_v24 = vld [vmem:[%s4610_s5 + $0xe4] sm:$0xf0] }
 0x37e   :  { %v1895_v29 = vpop.f32.mrf.mxu3  ;;  %v3218_v30 = vor.u32 %v3292_v24, %v3217_v62  ;;  %v2107_v24 = vperm.slane %v4335_v33, %v4028_v53 }
 0x37f   :  { %v2606_v60 = vpack.c.bf16 %v2574_v32, %v2574_v32  ;;  %v2415_v56 = vpack.c.bf16 %v2383_v36, %v2383_v36  ;;  %v1896_v37 = vadd.f32 %v1895_v29, %v4409_v61  ;;  %v2353_v32 = vunpack.c.l.bf16 %v2089_v17  ;;  %v3203_v29 = vld [vmem:[%s4610_s5 + $0xc8] sm:$0xf0] }
 0x380   :  { %v2355_v33 = vunpack.c.l.bf16 %v2107_v24 }
 0x381   :  { %v2638_v45 = vunpack.c.l.bf16 %v2606_v60  ;;  %v2447_v58 = vunpack.c.l.bf16 %v2415_v56  ;;  %v1968_v50 = vpack.c.bf16 %v1896_v37, %v1896_v37 }
 0x382   :  { %1863 = vmatmul.bf16.gmra.mxu2 %v3218_v30  ;;  %v3294_v30 = vld [vmem:[%s4610_s5 + $0xf4] sm:$0xf0] }
 0x383   :  { %v2862_v39 = vmul.f32 %v2717_v63, %v2638_v45  ;;  %v2479_v55 = vmul.f32 0.010009766, %v2447_v58  ;;  %v2320_v2 = vunpack.c.l.bf16 %v1968_v50  ;;  %1937 = vmatmul.bf16.gmra.mxu3 %v3198_v10  ;;  %v2098_v10 = vperm.slane %v4333_v15, %v4028_v53 }
 0x385   :  { %v2893_v35 = vadd.f32 %v2892_v54, %v2862_v39  ;;  %v2575_v3 = vmax.f32 %v2447_v58, %v2479_v55  ;;  %v2384_v5 = vadd.f32 %v2352_v0, %v2320_v2  ;;  %v2722_v54 = vpop.permute.xlu0 %2721  ;;  %v4506_v39 = vpop.f32.mrf.mxu2 }
 0x386   :  { %v1898_v52 = vpop.f32.mrf.mxu3 }
 0x387   :  { %v2607_v61 = vpack.c.bf16 %v2575_v3, %v2575_v3  ;;  %v2416_v18 = vpack.c.bf16 %v2384_v5, %v2384_v5  ;;  %v1899_v9 = vadd.f32 %v1898_v52, %v4431_v1  ;;  %v3287_v1 = vld [vmem:[%s4610_s5 + $0xc4] sm:$0xf]  ;;  %v2727_v5 = vpop.permute.xlu1 %2726  ;;  %v2354_v52 = vunpack.c.l.bf16 %v2098_v10 }
 0x388   :  { %v3206_v0 = vor.u32 %v3287_v1, %v3203_v29 }
 0x389   :  { %v2639_v4 = vunpack.c.l.bf16 %v2607_v61  ;;  %v2448_v59 = vunpack.c.l.bf16 %v2416_v18  ;;  %v1969_v48 = vpack.c.bf16 %v1899_v9, %v1899_v9 }
 0x38b   :  { %v2863_v36 = vmul.f32 %v2722_v54, %v2639_v4  ;;  %v2480_v6 = vmul.f32 0.010009766, %v2448_v59  ;;  %v2321_v43 = vunpack.c.l.bf16 %v1969_v48  ;;  %v3225_v48 = vld [vmem:[%s4610_s5 + $0xf0] sm:$0xf] }
 0x38d   :  { %v2894_v60 = vadd.f32 %v2893_v35, %v2863_v36  ;;  %v2576_v56 = vmax.f32 %v2448_v59, %v2480_v6  ;;  %v2385_v37 = vadd.f32 %v2353_v32, %v2321_v43  ;;  %v3226_v6 = vor.u32 %v3294_v30, %v3225_v48  ;;  %v2732_v43 = vpop.permute.xlu2 %2731  ;;  %v4517_v1 = vpop.f32.mrf.mxu2 }
 0x38e   :  { %v1900_v45 = vpop.f32.mrf.mxu3 }
 0x38f   :  { %v2608_v58 = vpack.c.bf16 %v2576_v56, %v2576_v56  ;;  %v2417_v50 = vpack.c.bf16 %v2385_v37, %v2385_v37  ;;  %v1901_v63 = vadd.f32 %v1900_v45, %v4437_v44  ;;  %v3211_v37 = vld [vmem:[%s4610_s5 + $0xd8] sm:$0xf0] }
 0x391   :  { %v2640_v55 = vunpack.c.l.bf16 %v2608_v58  ;;  %v2449_v2 = vunpack.c.l.bf16 %v2417_v50  ;;  %v1970_v3 = vpack.c.bf16 %v1901_v63, %v1901_v63  ;;  %v2116_v50 = vperm.slane %v4337_v7, %v4028_v53 }
 0x392   :  { %1868 = vmatmul.bf16.gmra.mxu2 %v3226_v6  ;;  %v2742_v6 = vpop.permute.xlu1 %2741 }
 0x393   :  { %v2864_v17 = vmul.f32 %v2727_v5, %v2640_v55  ;;  %v2481_v35 = vmul.f32 0.010009766, %v2449_v2  ;;  %v2322_v61 = vunpack.c.l.bf16 %v1970_v3  ;;  %1942 = vmatmul.bf16.gmra.mxu3 %v3206_v0 }
 0x395   :  { %v2895_v18 = vadd.f32 %v2894_v60, %v2864_v17  ;;  %v2577_v9 = vmax.f32 %v2449_v2, %v2481_v35  ;;  %v2386_v15 = vadd.f32 %v2354_v52, %v2322_v61  ;;  %v2737_v35 = vpop.permute.xlu0 %2736  ;;  %v2356_v61 = vunpack.c.l.bf16 %v2116_v50 }
 0x396   :  { %v1903_v62 = vpop.f32.mrf.mxu3 }
 0x397   :  { %v2609_v44 = vpack.c.bf16 %v2577_v9, %v2577_v9  ;;  %v2418_v4 = vpack.c.bf16 %v2386_v15, %v2386_v15  ;;  %v1904_v59 = vadd.f32 %v1903_v62, %v4459_v57  ;;  %v3289_v57 = vld [vmem:[%s4610_s5 + $0xd4] sm:$0xf] }
 0x398   :  { %v3214_v3 = vor.u32 %v3289_v57, %v3211_v37 }
 0x399   :  { %v2641_v54 = vunpack.c.l.bf16 %v2609_v44  ;;  %v2450_v32 = vunpack.c.l.bf16 %v2418_v4  ;;  %v1971_v36 = vpack.c.bf16 %v1904_v59, %v1904_v59  ;;  %v2125_v59 = vperm.slane %v4345_v20, %v4028_v53  ;;  %v3219_v20 = vld [vmem:[%s4610_s5 + $0xe8] sm:$0xf0] }
 0x39b   :  { %v2865_v29 = vmul.f32 %v2732_v43, %v2641_v54  ;;  %v2482_v60 = vmul.f32 0.010009766, %v2450_v32  ;;  %v2323_v56 = vunpack.c.l.bf16 %v1971_v36  ;;  %v2357_v43 = vunpack.c.l.bf16 %v2125_v59 }
 0x39d   :  { %v2896_v10 = vadd.f32 %v2895_v18, %v2865_v29  ;;  %v2578_v45 = vmax.f32 %v2450_v32, %v2482_v60  ;;  %v2387_v58 = vadd.f32 %v2355_v33, %v2323_v56  ;;  %v4528_v18 = vpop.f32.mrf.mxu2  ;;  %v3291_v56 = vld [vmem:[%s4610_s5 + $0xe4] sm:$0xf] }
 0x39e   :  { %v1905_v63 = vpop.f32.mrf.mxu3 }
 0x39f   :  { %v2610_v0 = vpack.c.bf16 %v2578_v45, %v2578_v45  ;;  %v2419_v55 = vpack.c.bf16 %v2387_v58, %v2387_v58  ;;  %v1906_v2 = vadd.f32 %v1905_v63, %v4464_v12 }
 0x3a1   :  { %v2642_v5 = vunpack.c.l.bf16 %v2610_v0  ;;  %v2451_v52 = vunpack.c.l.bf16 %v2419_v55  ;;  %v1972_v17 = vpack.c.bf16 %v1906_v2, %v1906_v2  ;;  %v3222_v55 = vor.u32 %v3291_v56, %v3219_v20 }
 0x3a2   :  { %v2152_v56 = vperm.slane %v4357_v34, %v4028_v53 }
 0x3a3   :  { %v2866_v9 = vmul.f32 %v2737_v35, %v2642_v5  ;;  %v2483_v15 = vmul.f32 0.010009766, %v2451_v52  ;;  %v2324_v62 = vunpack.c.l.bf16 %v1972_v17  ;;  %1947 = vmatmul.bf16.gmra.mxu3 %v3214_v3 }
 0x3a5   :  { %v2897_v24 = vadd.f32 %v2896_v10, %v2866_v9  ;;  %v2579_v44 = vmax.f32 %v2451_v52, %v2483_v15  ;;  %v2388_v7 = vadd.f32 %v2356_v61, %v2324_v62  ;;  %v4541_v58 = vpop.f32.mrf.mxu2  ;;  %v2747_v52 = vpop.permute.xlu2 %2746 }
 0x3a6   :  { %v1908_v4 = vpop.f32.mrf.mxu3 }
 0x3a7   :  { %v2611_v12 = vpack.c.bf16 %v2579_v44, %v2579_v44  ;;  %v2420_v48 = vpack.c.bf16 %v2388_v7, %v2388_v7  ;;  %v1909_v30 = vadd.f32 %v1908_v4, %v4483_v47  ;;  %v2134_v47 = vperm.slane %v4347_v21, %v4028_v53 }
 0x3a8   :  { %v2143_v44 = vperm.slane %v4349_v23, %v4028_v53  ;;  %v3227_v23 = vld [vmem:[%s4610_s5 + $0xf8] sm:$0xf0] }
 0x3a9   :  { %v2643_v54 = vunpack.c.l.bf16 %v2611_v12  ;;  %v2452_v32 = vunpack.c.l.bf16 %v2420_v48  ;;  %v1973_v36 = vpack.c.bf16 %v1909_v30, %v1909_v30  ;;  %v2358_v17 = vunpack.c.l.bf16 %v2134_v47 }
 0x3ab   :  { %v2867_v33 = vmul.f32 %v2742_v6, %v2643_v54  ;;  %v2484_v29 = vmul.f32 0.010009766, %v2452_v32  ;;  %v2325_v60 = vunpack.c.l.bf16 %v1973_v36  ;;  %v2752_v54 = vpop.permute.xlu0 %2751 }
 0x3ad   :  { %v2898_v57 = vadd.f32 %v2897_v24, %v2867_v33  ;;  %v2580_v37 = vmax.f32 %v2452_v32, %v2484_v29  ;;  %v2389_v10 = vadd.f32 %v2357_v43, %v2325_v60  ;;  %v4547_v59 = vpop.f32.mrf.mxu2  ;;  %v2359_v32 = vunpack.c.l.bf16 %v2143_v44  ;;  %v3293_v33 = vld [vmem:[%s4610_s5 + $0xf4] sm:$0xf]  ;;  %s3334_s5 = smov [#allocation3]  }
 0x3ae   :  { %v1910_v45 = vpop.f32.mrf.mxu3  ;;  %v3230_v47 = vor.u32 %v3293_v33, %v3227_v23  ;;  %s2964_s6 = sshll.u32 %s3334_s5, 4  ;;  %s2965_s6 = int_to_ptr.vmem [resolvable:$true] %s2964_s6 }
 0x3af   :  { %v2612_v50 = vpack.c.bf16 %v2580_v37, %v2580_v37  ;;  %v2421_v63 = vpack.c.bf16 %v2389_v10, %v2389_v10  ;;  %v1911_v0 = vadd.f32 %v1910_v45, %v4486_v13 }
 0x3b1   :  { %v2644_v2 = vunpack.c.l.bf16 %v2612_v50  ;;  %v2453_v3 = vunpack.c.l.bf16 %v2421_v63  ;;  %v1974_v5 = vpack.c.bf16 %v1911_v0, %v1911_v0  ;;  %v2757_v0 = vpop.permute.xlu1 %2756 }
 0x3b3   :  { %v2868_v35 = vmul.f32 %v2747_v52, %v2644_v2  ;;  %v2485_v61 = vmul.f32 0.010009766, %v2453_v3  ;;  %v2326_v9 = vunpack.c.l.bf16 %v1974_v5  ;;  %1952 = vmatmul.bf16.gmra.mxu3 %v3222_v55  ;;  %v2360_v2 = vunpack.c.l.bf16 %v2152_v56 }
 0x3b5   :  { %v2899_v15 = vadd.f32 %v2898_v57, %v2868_v35  ;;  %v2581_v62 = vmax.f32 %v2453_v3, %v2485_v61  ;;  %v2390_v21 = vadd.f32 %v2358_v17, %v2326_v9  ;;  %v4558_v55 = vpop.f32.mrf.mxu2  ;;  %v2161_v9 = vperm.slane %v4359_v25, %v4028_v53 }
 0x3b6   :  { %v1913_v24 = vpop.f32.mrf.mxu3  ;;  %v2170_v25 = vperm.slane %v4361_v42, %v4028_v53  ;;  %v2179_v42 = vperm.slane %v4375_v38, %v4028_v53 }
 0x3b7   :  { %v2613_v7 = vpack.c.bf16 %v2581_v62, %v2581_v62  ;;  %v2422_v4 = vpack.c.bf16 %v2390_v21, %v2390_v21  ;;  %v1914_v13 = vadd.f32 %v1913_v24, %v4506_v39 }
 0x3b8   :  { %v2362_v56 = vunpack.c.l.bf16 %v2170_v25 }
 0x3b9   :  { %v2645_v12 = vunpack.c.l.bf16 %v2613_v7  ;;  %v2454_v48 = vunpack.c.l.bf16 %v2422_v4  ;;  %v1975_v30 = vpack.c.bf16 %v1914_v13, %v1914_v13  ;;  %v2762_v7 = vpop.permute.xlu2 %2761  ;;  %v2361_v4 = vunpack.c.l.bf16 %v2161_v9 }
 0x3bb   :  { %v2869_v36 = vmul.f32 %v2752_v54, %v2645_v12  ;;  %v2486_v6 = vmul.f32 0.010009766, %v2454_v48  ;;  %v2327_v43 = vunpack.c.l.bf16 %v1975_v30 }
 0x3bd   :  { %v2900_v29 = vadd.f32 %v2899_v15, %v2869_v36  ;;  %v2582_v39 = vmax.f32 %v2454_v48, %v2486_v6  ;;  %v2391_v60 = vadd.f32 %v2359_v32, %v2327_v43  ;;  %v1839_v30 = vpop.f32.mrf.mxu2 }
 0x3be   :  { %v1915_v20 = vpop.f32.mrf.mxu3 }
 0x3bf   :  { %v2614_v57 = vpack.c.bf16 %v2582_v39, %v2582_v39  ;;  %v2423_v37 = vpack.c.bf16 %v2391_v60, %v2391_v60  ;;  %v1916_v10 = vadd.f32 %v1915_v20, %v4517_v1  ;;  %v2767_v60 = vpop.permute.xlu0 %2766 }
 0x3c1   :  { %v2646_v45 = vunpack.c.l.bf16 %v2614_v57  ;;  %v2455_v50 = vunpack.c.l.bf16 %v2423_v37  ;;  %v1976_v63 = vpack.c.bf16 %v1916_v10, %v1916_v10 }
 0x3c3   :  { %v2870_v3 = vmul.f32 %v2757_v0, %v2646_v45  ;;  %v2487_v5 = vmul.f32 0.010009766, %v2455_v50  ;;  %v2328_v52 = vunpack.c.l.bf16 %v1976_v63  ;;  %1957 = vmatmul.bf16.gmra.mxu3 %v3230_v47 }
 0x3c5   :  { %v2901_v17 = vadd.f32 %v2900_v29, %v2870_v3  ;;  %v2583_v35 = vmax.f32 %v2455_v50, %v2487_v5  ;;  %v2392_v34 = vadd.f32 %v2360_v2, %v2328_v52  ;;  %v1841_v63 = vpop.f32.mrf.mxu2 }
 0x3c6   :  { %v1918_v61 = vpop.f32.mrf.mxu3 }
 0x3c7   :  { %v2615_v1 = vpack.c.bf16 %v2583_v35, %v2583_v35  ;;  %v2424_v15 = vpack.c.bf16 %v2392_v34, %v2392_v34  ;;  %v1919_v62 = vadd.f32 %v1918_v61, %v4528_v18  ;;  %v2363_v35 = vunpack.c.l.bf16 %v2179_v42 }
 0x3c9   :  { %v2647_v21 = vunpack.c.l.bf16 %v2615_v1  ;;  %v2456_v24 = vunpack.c.l.bf16 %v2424_v15  ;;  %v1977_v44 = vpack.c.bf16 %v1919_v62, %v1919_v62 }
 0x3cb   :  { %v2871_v13 = vmul.f32 %v2762_v7, %v2647_v21  ;;  %v2488_v12 = vmul.f32 0.010009766, %v2456_v24  ;;  %v2329_v48 = vunpack.c.l.bf16 %v1977_v44 }
 0x3cd   :  { %v2902_v54 = vadd.f32 %v2901_v17, %v2871_v13  ;;  %v2584_v32 = vmax.f32 %v2456_v24, %v2488_v12  ;;  %v2393_v36 = vadd.f32 %v2361_v4, %v2329_v48  ;;  %v2772_v17 = vpop.permute.xlu1 %2771  ;;  %v2188_v24 = vperm.slane %v4377_v51, %v4028_v53  ;;  %v2777_v48 = vpop.permute.xlu2 %2776 }
 0x3ce   :  { %v1920_v6 = vpop.f32.mrf.mxu3  ;;  %v2197_v51 = vperm.slane %v4379_v41, %v4028_v53 }
 0x3cf   :  { %v2616_v43 = vpack.c.bf16 %v2584_v32, %v2584_v32  ;;  %v2425_v33 = vpack.c.bf16 %v2393_v36, %v2393_v36  ;;  %v1921_v18 = vadd.f32 %v1920_v6, %v4541_v58 }
 0x3d1   :  { %v2648_v23 = vunpack.c.l.bf16 %v2616_v43  ;;  %v2457_v29 = vunpack.c.l.bf16 %v2425_v33  ;;  %v1978_v39 = vpack.c.bf16 %v1921_v18, %v1921_v18 }
 0x3d3   :  { %v2872_v20 = vmul.f32 %v2767_v60, %v2648_v23  ;;  %v2489_v57 = vmul.f32 0.010009766, %v2457_v29  ;;  %v2330_v37 = vunpack.c.l.bf16 %v1978_v39 }
 0x3d5   :  { %v2903_v10 = vadd.f32 %v2902_v54, %v2872_v20  ;;  %v2585_v47 = vmax.f32 %v2457_v29, %v2489_v57  ;;  %v2394_v45 = vadd.f32 %v2362_v56, %v2330_v37  ;;  %v2364_v54 = vunpack.c.l.bf16 %v2188_v24  ;;  %v2782_v20 = vpop.permute.xlu0 %2781 }
 0x3d6   :  { %v1923_v50 = vpop.f32.mrf.mxu3  ;;  %v2365_v37 = vunpack.c.l.bf16 %v2197_v51 }
 0x3d7   :  { %v2617_v0 = vpack.c.bf16 %v2585_v47, %v2585_v47  ;;  %v2426_v2 = vpack.c.bf16 %v2394_v45, %v2394_v45  ;;  %v1924_v58 = vadd.f32 %v1923_v50, %v4547_v59  ;;  %v1844_v59 = vpop.f32.mrf.mxu2 }
 0x3d9   :  { %v2649_v3 = vunpack.c.l.bf16 %v2617_v0  ;;  %v2458_v5 = vunpack.c.l.bf16 %v2426_v2  ;;  %v1979_v52 = vpack.c.bf16 %v1924_v58, %v1924_v58  ;;  %v2206_v58 = vperm.slane %v4383_v27, %v4028_v53 }
 0x3db   :  { %v2873_v34 = vmul.f32 %v2772_v17, %v2649_v3  ;;  %v2490_v61 = vmul.f32 0.010009766, %v2458_v5  ;;  %v2331_v9 = vunpack.c.l.bf16 %v1979_v52 }
 0x3dd   :  { %v2904_v1 = vadd.f32 %v2903_v10, %v2873_v34  ;;  %v2586_v15 = vmax.f32 %v2458_v5, %v2490_v61  ;;  %v2395_v62 = vadd.f32 %v2363_v35, %v2331_v9  ;;  %v2787_v35 = vpop.permute.xlu1 %2786  ;;  %v2366_v34 = vunpack.c.l.bf16 %v2206_v58 }
 0x3de   :  { %v1925_v21 = vpop.f32.mrf.mxu3 }
 0x3df   :  { %v2618_v38 = vpack.c.bf16 %v2586_v15, %v2586_v15  ;;  %v2427_v44 = vpack.c.bf16 %v2395_v62, %v2395_v62  ;;  %v1926_v7 = vadd.f32 %v1925_v21, %v4558_v55  ;;  %v1846_v57 = vpop.f32.mrf.mxu2 }
 0x3e1   :  { %v2650_v4 = vunpack.c.l.bf16 %v2618_v38  ;;  %v2459_v13 = vunpack.c.l.bf16 %v2427_v44  ;;  %v1980_v12 = vpack.c.bf16 %v1926_v7, %v1926_v7  ;;  %v2215_v44 = vperm.slane %v4391_v8, %v4028_v53 }
 0x3e3   :  { %v2874_v32 = vmul.f32 %v2777_v48, %v2650_v4  ;;  %v2491_v36 = vmul.f32 0.010009766, %v2459_v13  ;;  %v2332_v6 = vunpack.c.l.bf16 %v1980_v12  ;;  %v2792_v48 = vpop.permute.xlu2 %2791 }
 0x3e5   :  { %v2905_v25 = vadd.f32 %v2904_v1, %v2874_v32  ;;  %v2587_v43 = vmax.f32 %v2459_v13, %v2491_v36  ;;  %v2396_v33 = vadd.f32 %v2364_v54, %v2332_v6  ;;  %v2367_v54 = vunpack.c.l.bf16 %v2215_v44 }
 0x3e6   :  { %v1928_v18 = vpop.f32.mrf.mxu3 }
 0x3e7   :  { %v2619_v23 = vpack.c.bf16 %v2587_v43, %v2587_v43  ;;  %v2428_v29 = vpack.c.bf16 %v2396_v33, %v2396_v33  ;;  %v1929_v39 = vadd.f32 %v1928_v18, %v1839_v30  ;;  %v1849_v15 = vpop.f32.mrf.mxu2 }
 0x3e9   :  { %v2651_v55 = vunpack.c.l.bf16 %v2619_v23  ;;  %v2460_v60 = vunpack.c.l.bf16 %v2428_v29  ;;  %v1981_v56 = vpack.c.bf16 %v1929_v39, %v1929_v39  ;;  %v2224_v23 = vperm.slane %v4393_v46, %v4028_v53 }
 0x3eb   :  { %v2875_v10 = vmul.f32 %v2782_v20, %v2651_v55  ;;  %v2492_v47 = vmul.f32 0.010009766, %v2460_v60  ;;  %v2333_v45 = vunpack.c.l.bf16 %v1981_v56  ;;  %v2797_v56 = vpop.permute.xlu0 %2796  ;;  %v2368_v20 = vunpack.c.l.bf16 %v2224_v23 }
 0x3ed   :  { %v2906_v50 = vadd.f32 %v2905_v25, %v2875_v10  ;;  %v2588_v42 = vmax.f32 %v2460_v60, %v2492_v47  ;;  %v2397_v0 = vadd.f32 %v2365_v37, %v2333_v45 }
 0x3ee   :  { %v1930_v2 = vpop.f32.mrf.mxu3 }
 0x3ef   :  { %v2620_v41 = vpack.c.bf16 %v2588_v42, %v2588_v42  ;;  %v2429_v3 = vpack.c.bf16 %v2397_v0, %v2397_v0  ;;  %v1931_v5 = vadd.f32 %v1930_v2, %v1841_v63  ;;  %v1851_v51 = vpop.f32.mrf.mxu2  ;;  %v2233_v2 = vperm.slane %v4403_v26, %v4028_v53 }
 0x3f1   :  { %v2652_v30 = vunpack.c.l.bf16 %v2620_v41  ;;  %v2461_v52 = vunpack.c.l.bf16 %v2429_v3  ;;  %v1982_v17 = vpack.c.bf16 %v1931_v5, %v1931_v5 }
 0x3f3   :  { %v2876_v61 = vmul.f32 %v2787_v35, %v2652_v30  ;;  %v2493_v9 = vmul.f32 0.010009766, %v2461_v52  ;;  %v2334_v1 = vunpack.c.l.bf16 %v1982_v17  ;;  %v2369_v17 = vunpack.c.l.bf16 %v2233_v2 }
 0x3f5   :  { %v2907_v62 = vadd.f32 %v2906_v50, %v2876_v61  ;;  %v2589_v21 = vmax.f32 %v2461_v52, %v2493_v9  ;;  %v2398_v24 = vadd.f32 %v2366_v34, %v2334_v1  ;;  %v2802_v52 = vpop.permute.xlu1 %2801 }
 0x3f6   :  { %v1933_v38 = vpop.f32.mrf.mxu3 }
 0x3f7   :  { %v2621_v27 = vpack.c.bf16 %v2589_v21, %v2589_v21  ;;  %v2430_v7 = vpack.c.bf16 %v2398_v24, %v2398_v24  ;;  %v1934_v4 = vadd.f32 %v1933_v38, %v1844_v59  ;;  %v1854_v3 = vpop.f32.mrf.mxu2  ;;  %v2242_v24 = vperm.slane %v4405_v22, %v4028_v53 }
 0x3f9   :  { %v2653_v63 = vunpack.c.l.bf16 %v2621_v27  ;;  %v2462_v13 = vunpack.c.l.bf16 %v2430_v7  ;;  %v1983_v12 = vpack.c.bf16 %v1934_v4, %v1934_v4  ;;  %v2807_v4 = vpop.permute.xlu2 %2806 }
 0x3fb   :  { %v2877_v32 = vmul.f32 %v2792_v48, %v2653_v63  ;;  %v2494_v36 = vmul.f32 0.010009766, %v2462_v13  ;;  %v2335_v6 = vunpack.c.l.bf16 %v1983_v12 }
 0x3fd   :  { %v2908_v25 = vadd.f32 %v2907_v62, %v2877_v32  ;;  %v2590_v43 = vmax.f32 %v2462_v13, %v2494_v36  ;;  %v2399_v33 = vadd.f32 %v2367_v54, %v2335_v6  ;;  %v2370_v13 = vunpack.c.l.bf16 %v2242_v24 }
 0x3fe   :  { %v1935_v18 = vpop.f32.mrf.mxu3 }
 0x3ff   :  { %v2622_v8 = vpack.c.bf16 %v2590_v43, %v2590_v43  ;;  %v2431_v29 = vpack.c.bf16 %v2399_v33, %v2399_v33  ;;  %v1936_v39 = vadd.f32 %v1935_v18, %v1846_v57  ;;  %v1856_v63 = vpop.f32.mrf.mxu2  ;;  %v2251_v43 = vperm.slane %v4407_v49, %v4028_v53 }
 0x401   :  { %v2654_v59 = vunpack.c.l.bf16 %v2622_v8  ;;  %v2463_v55 = vunpack.c.l.bf16 %v2431_v29  ;;  %v1984_v60 = vpack.c.bf16 %v1936_v39, %v1936_v39  ;;  %v2812_v29 = vpop.permute.xlu0 %2811  ;;  %v2371_v39 = vunpack.c.l.bf16 %v2251_v43 }
 0x403   :  { %v2878_v37 = vmul.f32 %v2797_v56, %v2654_v59  ;;  %v2495_v10 = vmul.f32 0.010009766, %v2463_v55  ;;  %v2336_v47 = vunpack.c.l.bf16 %v1984_v60 }
 0x405   :  { %v2909_v45 = vadd.f32 %v2908_v25, %v2878_v37  ;;  %v2591_v50 = vmax.f32 %v2463_v55, %v2495_v10  ;;  %v2400_v42 = vadd.f32 %v2368_v20, %v2336_v47 }
 0x406   :  { %v1938_v0 = vpop.f32.mrf.mxu3 }
 0x407   :  { %v2623_v58 = vpack.c.bf16 %v2591_v50, %v2591_v50  ;;  %v2432_v46 = vpack.c.bf16 %v2400_v42, %v2400_v42  ;;  %v1939_v41 = vadd.f32 %v1938_v0, %v1849_v15  ;;  %v1859_v56 = vpop.f32.mrf.mxu2 }
 0x409   :  { %v2655_v57 = vunpack.c.l.bf16 %v2623_v58  ;;  %v2464_v5 = vunpack.c.l.bf16 %v2432_v46  ;;  %v1985_v30 = vpack.c.bf16 %v1939_v41, %v1939_v41  ;;  %v2817_v46 = vpop.permute.xlu1 %2816  ;;  %v2827_v43 = vpop.permute.xlu0 %2826 }
 0x40b   :  { %v2879_v35 = vmul.f32 %v2802_v52, %v2655_v57  ;;  %v2496_v34 = vmul.f32 0.010009766, %v2464_v5  ;;  %v2337_v61 = vunpack.c.l.bf16 %v1985_v30 }
 0x40d   :  { %v2910_v9 = vadd.f32 %v2909_v45, %v2879_v35  ;;  %v2592_v1 = vmax.f32 %v2464_v5, %v2496_v34  ;;  %v2401_v62 = vadd.f32 %v2369_v17, %v2337_v61  ;;  %v2260_v45 = vperm.slane %v4419_v11, %v4028_v53 }
 0x40e   :  { %v1940_v21 = vpop.f32.mrf.mxu3  ;;  %v2269_v61 = vperm.slane %v4427_v40, %v4028_v53 }
 0x40f   :  { %v2624_v26 = vpack.c.bf16 %v2592_v1, %v2592_v1  ;;  %v2433_v38 = vpack.c.bf16 %v2401_v62, %v2401_v62  ;;  %v1941_v44 = vadd.f32 %v1940_v21, %v1851_v51  ;;  %v2372_v41 = vunpack.c.l.bf16 %v2260_v45  ;;  %v1861_v35 = vpop.f32.mrf.mxu2 }
 0x411   :  { %v2656_v15 = vunpack.c.l.bf16 %v2624_v26  ;;  %v2465_v27 = vunpack.c.l.bf16 %v2433_v38  ;;  %v1986_v7 = vpack.c.bf16 %v1941_v44, %v1941_v44  ;;  %v2822_v26 = vpop.permute.xlu2 %2821  ;;  %v2373_v38 = vunpack.c.l.bf16 %v2269_v61 }
 0x413   :  { %v2880_v12 = vmul.f32 %v2807_v4, %v2656_v15  ;;  %v2497_v48 = vmul.f32 0.010009766, %v2465_v27  ;;  %v2338_v54 = vunpack.c.l.bf16 %v1986_v7 }
 0x415   :  { %v2911_v32 = vadd.f32 %v2910_v9, %v2880_v12  ;;  %v2593_v36 = vmax.f32 %v2465_v27, %v2497_v48  ;;  %v2402_v6 = vadd.f32 %v2370_v13, %v2338_v54  ;;  %v2278_v12 = vperm.slane %v4429_v14, %v4028_v53 }
 0x416   :  { %v1943_v25 = vpop.f32.mrf.mxu3 }
 0x417   :  { %v2625_v22 = vpack.c.bf16 %v2593_v36, %v2593_v36  ;;  %v2434_v33 = vpack.c.bf16 %v2402_v6, %v2402_v6  ;;  %v1944_v18 = vadd.f32 %v1943_v25, %v1854_v3 }
 0x419   :  { %v2657_v51 = vunpack.c.l.bf16 %v2625_v22  ;;  %v2466_v23 = vunpack.c.l.bf16 %v2434_v33  ;;  %v1987_v8 = vpack.c.bf16 %v1944_v18, %v1944_v18  ;;  %v2374_v22 = vunpack.c.l.bf16 %v2278_v12 }
 0x41b   :  { %v2881_v59 = vmul.f32 %v2812_v29, %v2657_v51  ;;  %v2498_v55 = vmul.f32 0.010009766, %v2466_v23  ;;  %v2339_v60 = vunpack.c.l.bf16 %v1987_v8 }
 0x41d   :  { %v2912_v20 = vadd.f32 %v2911_v32, %v2881_v59  ;;  %v2594_v37 = vmax.f32 %v2466_v23, %v2498_v55  ;;  %v2403_v10 = vadd.f32 %v2371_v39, %v2339_v60  ;;  %v1864_v32 = vpop.f32.mrf.mxu2  ;;  %v2287_v59 = vperm.slane %v4435_v19, %v4028_v53 }
 0x41e   :  { %v1945_v47 = vpop.f32.mrf.mxu3 }
 0x41f   :  { %v2626_v49 = vpack.c.bf16 %v2594_v37, %v2594_v37  ;;  %v2435_v50 = vpack.c.bf16 %v2403_v10, %v2403_v10  ;;  %v1946_v42 = vadd.f32 %v1945_v47, %v1856_v63  ;;  %v2832_v10 = vpop.permute.xlu1 %2831  ;;  %v2375_v45 = vunpack.c.l.bf16 %v2287_v59 }
 0x421   :  { %v2658_v0 = vunpack.c.l.bf16 %v2626_v49  ;;  %v2467_v2 = vunpack.c.l.bf16 %v2435_v50  ;;  %v1988_v58 = vpack.c.bf16 %v1946_v42, %v1946_v42 }
 0x423   :  { %v2882_v3 = vmul.f32 %v2817_v46, %v2658_v0  ;;  %v2499_v57 = vmul.f32 0.010009766, %v2467_v2  ;;  %v2340_v5 = vunpack.c.l.bf16 %v1988_v58 }
 0x425   :  { %v2913_v30 = vadd.f32 %v2912_v20, %v2882_v3  ;;  %v2595_v52 = vmax.f32 %v2467_v2, %v2499_v57  ;;  %v2404_v17 = vadd.f32 %v2372_v41, %v2340_v5  ;;  %v1866_v47 = vpop.f32.mrf.mxu2  ;;  %v2296_v41 = vperm.slane %v4441_v28, %v4028_v53 }
 0x426   :  { %v1948_v34 = vpop.f32.mrf.mxu3 }
 0x427   :  { %v2627_v11 = vpack.c.bf16 %v2595_v52, %v2595_v52  ;;  %v2436_v9 = vpack.c.bf16 %v2404_v17, %v2404_v17  ;;  %v1949_v1 = vadd.f32 %v1948_v34, %v1859_v56  ;;  %v2837_v17 = vpop.permute.xlu2 %2836 }
 0x429   :  { %v2659_v62 = vunpack.c.l.bf16 %v2627_v11  ;;  %v2468_v21 = vunpack.c.l.bf16 %v2436_v9  ;;  %v1989_v24 = vpack.c.bf16 %v1949_v1, %v1949_v1 }
 0x42b   :  { %v2883_v44 = vmul.f32 %v2822_v26, %v2659_v62  ;;  %v2500_v15 = vmul.f32 0.010009766, %v2468_v21  ;;  %v2341_v27 = vunpack.c.l.bf16 %v1989_v24  ;;  %v2305_v26 = vperm.slane %v4443_v16, %v4028_v53 }
 0x42d   :  { %v2914_v7 = vadd.f32 %v2913_v30, %v2883_v44  ;;  %v2596_v4 = vmax.f32 %v2468_v21, %v2500_v15  ;;  %v2405_v63 = vadd.f32 %v2373_v38, %v2341_v27  ;;  %v1869_v9 = vpop.f32.mrf.mxu2 }
 0x42e   :  { %v1950_v13 = vpop.f32.mrf.mxu3 }
 0x42f   :  { %v2628_v48 = vpack.c.bf16 %v2596_v4, %v2596_v4  ;;  %v2437_v40 = vpack.c.bf16 %v2405_v63, %v2405_v63  ;;  %v1951_v54 = vadd.f32 %v1950_v13, %v1861_v35  ;;  %v2376_v35 = vunpack.c.l.bf16 %v2296_v41  ;;  %v2842_v4 = vpop.permute.xlu0 %2841 }
 0x430   :  { %v2377_v63 = vunpack.c.l.bf16 %v2305_v26 }
 0x431   :  { %v2660_v36 = vunpack.c.l.bf16 %v2628_v48  ;;  %v2469_v6 = vunpack.c.l.bf16 %v2437_v40  ;;  %v1990_v25 = vpack.c.bf16 %v1951_v54, %v1951_v54 }
 0x433   :  { %v2884_v33 = vmul.f32 %v2827_v43, %v2660_v36  ;;  %v2501_v18 = vmul.f32 0.010009766, %v2469_v6  ;;  %v2342_v51 = vunpack.c.l.bf16 %v1990_v25  ;;  %v2314_v25 = vperm.slane %v4462_v31, %v4028_v53 }
 0x435   :  { %v2915_v23 = vadd.f32 %v2914_v7, %v2884_v33  ;;  %v2597_v8 = vmax.f32 %v2469_v6, %v2501_v18  ;;  %v2406_v29 = vadd.f32 %v2374_v22, %v2342_v51  ;;  %v1871_v36 = vpop.f32.mrf.mxu2 }
 0x436   :  { %v1953_v39 = vpop.f32.mrf.mxu3 }
 0x437   :  { %v2629_v14 = vpack.c.bf16 %v2597_v8, %v2597_v8  ;;  %v2438_v55 = vpack.c.bf16 %v2406_v29, %v2406_v29  ;;  %v1954_v60 = vadd.f32 %v1953_v39, %v1864_v32  ;;  %v2378_v8 = vunpack.c.l.bf16 %v2314_v25 }
 0x439   :  { %v2661_v56 = vunpack.c.l.bf16 %v2629_v14  ;;  %v2470_v20 = vunpack.c.l.bf16 %v2438_v55  ;;  %v1991_v37 = vpack.c.bf16 %v1954_v60, %v1954_v60 }
 0x43b   :  { %v2885_v49 = vmul.f32 %v2832_v10, %v2661_v56  ;;  %v2502_v50 = vmul.f32 0.010009766, %v2470_v20  ;;  %v2343_v42 = vunpack.c.l.bf16 %v1991_v37 }
 0x43d   :  { %v2916_v0 = vadd.f32 %v2915_v23, %v2885_v49  ;;  %v2598_v2 = vmax.f32 %v2470_v20, %v2502_v50  ;;  %v2407_v58 = vadd.f32 %v2375_v45, %v2343_v42  ;;  %v2847_v23 = vpop.permute.xlu1 %2846 }
 0x43e   :  { %v1955_v46 = vpop.f32.mrf.mxu3 }
 0x43f   :  { %v2630_v19 = vpack.c.bf16 %v2598_v2, %v2598_v2  ;;  %v2439_v3 = vpack.c.bf16 %v2407_v58, %v2407_v58  ;;  %v1956_v57 = vadd.f32 %v1955_v46, %v1866_v47  ;;  %v2852_v47 = vpop.permute.xlu2 %2851 }
 0x441   :  { %v2662_v5 = vunpack.c.l.bf16 %v2630_v19  ;;  %v2471_v30 = vunpack.c.l.bf16 %v2439_v3  ;;  %v1992_v52 = vpack.c.bf16 %v1956_v57, %v1956_v57 }
 0x443   :  { %v2886_v34 = vmul.f32 %v2837_v17, %v2662_v5  ;;  %v2503_v61 = vmul.f32 0.010009766, %v2471_v30  ;;  %v2344_v11 = vunpack.c.l.bf16 %v1992_v52 }
 0x445   :  { %v2917_v1 = vadd.f32 %v2916_v0, %v2886_v34  ;;  %v2599_v62 = vmax.f32 %v2471_v30, %v2503_v61  ;;  %v2408_v21 = vadd.f32 %v2376_v35, %v2344_v11  ;;  %v2857_v0 = vpop.permute.xlu0 %2856  ;;  %v2932_v57 = vpop.permute.xlu1 %2931 }
 0x446   :  { %v1958_v24 = vpop.f32.mrf.mxu3  ;;  %v2934_v30 = vperm.slane %v2932_v57, 0 }
 0x447   :  { %v2631_v28 = vpack.c.bf16 %v2599_v62, %v2599_v62  ;;  %v2440_v38 = vpack.c.bf16 %v2408_v21, %v2408_v21  ;;  %v1959_v44 = vadd.f32 %v1958_v24, %v1869_v9 }
 0x449   :  { %v2663_v15 = vunpack.c.l.bf16 %v2631_v28  ;;  %v2472_v27 = vunpack.c.l.bf16 %v2440_v38  ;;  %v1993_v7 = vpack.c.bf16 %v1959_v44, %v1959_v44 }
 0x44b   :  { %v2887_v13 = vmul.f32 %v2842_v4, %v2663_v15  ;;  %v2504_v12 = vmul.f32 0.010009766, %v2472_v27  ;;  %v2345_v48 = vunpack.c.l.bf16 %v1993_v7 }
 0x44d   :  { %v2918_v40 = vadd.f32 %v2917_v1, %v2887_v13  ;;  %v2600_v54 = vmax.f32 %v2472_v27, %v2504_v12  ;;  %v2409_v32 = vadd.f32 %v2377_v63, %v2345_v48 }
 0x44e   :  { %v1960_v6 = vpop.f32.mrf.mxu3 }
 0x44f   :  { %v2632_v16 = vpack.c.bf16 %v2600_v54, %v2600_v54  ;;  %v2441_v43 = vpack.c.bf16 %v2409_v32, %v2409_v32  ;;  %v1961_v22 = vadd.f32 %v1960_v6, %v1871_v36 }
 0x451   :  { %v2664_v33 = vunpack.c.l.bf16 %v2632_v16  ;;  %v2473_v18 = vunpack.c.l.bf16 %v2441_v43  ;;  %v1994_v51 = vpack.c.bf16 %v1961_v22, %v1961_v22 }
 0x453   :  { %v2888_v29 = vmul.f32 %v2847_v23, %v2664_v33  ;;  %v2505_v39 = vmul.f32 0.010009766, %v2473_v18  ;;  %v2346_v59 = vunpack.c.l.bf16 %v1994_v51 }
 0x455   :  { %v2919_v14 = vadd.f32 %v2918_v40, %v2888_v29  ;;  %v2601_v55 = vmax.f32 %v2473_v18, %v2505_v39  ;;  %v2410_v60 = vadd.f32 %v2378_v8, %v2346_v59 }
 0x457   :  { %v2633_v56 = vpack.c.bf16 %v2601_v55, %v2601_v55  ;;  %v2442_v20 = vpack.c.bf16 %v2410_v60, %v2410_v60 }
 0x459   :  { %v2665_v37 = vunpack.c.l.bf16 %v2633_v56  ;;  %v2474_v10 = vunpack.c.l.bf16 %v2442_v20 }
 0x45b   :  { %v2889_v53 = vmul.f32 %v2852_v47, %v2665_v37  ;;  %v2506_v31 = vmul.f32 0.010009766, %v2474_v10 }
 0x45d   :  { %v2920_v45 = vadd.f32 %v2919_v14, %v2889_v53  ;;  %v2602_v49 = vmax.f32 %v2474_v10, %v2506_v31 }
 0x45f   :  { %v2634_v50 = vpack.c.bf16 %v2602_v49, %v2602_v49 }
 0x461   :  { %v2666_v42 = vunpack.c.l.bf16 %v2634_v50 }
 0x463   :  { %v2890_v2 = vmul.f32 %v2857_v0, %v2666_v42 }
 0x465   :  { %v2921_v58 = vadd.f32 %v2920_v45, %v2890_v2 }
 0x467   :  { %v2922_v46 = vrot.slane %v2921_v58, 4 }
 0x469   :  { %v2923_v41 = vadd.f32 %v2922_v46, %v2921_v58 }
 0x46b   :  { %v2924_v19 = vrot.slane %v2923_v41, 2 }
 0x46d   :  { %v2925_v3 = vadd.f32 %v2924_v19, %v2923_v41 }
 0x46f   :  { %v2926_v5 = vrot.slane %v2925_v3, 1 }
 0x471   :  { %v2927_v52 = vadd.f32 %v2926_v5, %v2925_v3 }
 0x473   :  { %v2935_v17 = vadd.f32 %v2934_v30, %v2927_v52 }
 0x475   :  { %vm2936_vm0 = vcmp.ge.f32.partialorder %v2935_v17, 0.0  ;;  %v2937_v35 = vsub.f32 0.0, %v2935_v17 }
 0x477   :  { %v2938_v34 = vsel %vm2936_vm0, %v2937_v35, %v2935_v17 }
 0x478   :  { %v2939_v61 = vmul.f32 1.442695, %v2938_v34 }
 0x47a   :  { %3302 = vpow2.f32 %v2939_v61 }
 0x480   :  { %v3303_v11 = vpop.eup %3302 }
 0x481   :  { %v2942_v9 = vadd.f32 1.0, %v3303_v11  ;;  %v2941_v27 = vsel %vm2936_vm0, 1.0, %v3303_v11 }
 0x483   :  { %3304 = vrcp.f32 %v2942_v9  ;;  %v2954_v24 = vand.u32 2147483648, %v2942_v9  ;;  %v2952_v28 = vand.u32 2147483647, %v2942_v9  ;;  %vm2948_vm2 = vweird.f32 %v2942_v9 }
 0x485   :  { %v2955_v44 = vor.u32 1.1754944e-38, %v2954_v24  ;;  %vm2953_vm4 = vcmp.eq.f32.partialorder %v2952_v28, 8.507059e+37 }
 0x489   :  { %v3305_v1 = vpop.eup %3304 }
 0x48a   :  { %v2944_v62 = vmul.f32 %v3305_v1, %v2942_v9  ;;  %vm2949_vm1 = vweird.f32 %v3305_v1 }
 0x48b   :  { %vm2950_vm3 = vmor %vm2948_vm2, %vm2949_vm1 }
 0x48c   :  { %v2945_v21 = vsub.f32 1.0, %v2944_v62 }
 0x48e   :  { %v2946_v26 = vmul.f32 %v3305_v1, %v2945_v21 }
 0x490   :  { %v2947_v38 = vadd.f32 %v3305_v1, %v2946_v26 }
 0x492   :  { %v2951_v15 = vsel %vm2950_vm3, %v3305_v1, %v2947_v38 }
 0x493   :  { %v2956_v7 = vsel %vm2953_vm4, %v2955_v44, %v2951_v15 }
 0x494   :  { %v2957_v4 = vmul.f32 %v2956_v7, %v2941_v27 }
 0x496   :  { %2958 = vst [vmem:[#allocation3] sm:$0x1] %v2957_v4 }
 0x497   :  { %2969 = dma.vmem_to_hbm [thread:$0]  %s2965_s6, 16, %s2967_s18, [#allocation4]  }
 0x498   :  { %3330 = dma.done.wait [#allocation4], 16  }
 0x499   :  { %3331 = vsyncadd [#allocation4], 4294967280 }
 0x49a   :  { %2974 = vsyncpa [#allocation4], 1 }

</bundles_post_ra>
